<compile_context>
chip_gen: v6e
topology: v6e:2x2x1
jax: 0.10.0
libtpu: 0.0.40
codegen_flags: <defaults>
</compile_context>

<pallas_src>
import functools

import jax
import jax.numpy as jnp
import numpy as np
from jax.experimental import pallas as pl
from jax.experimental.pallas import tpu as pltpu


def _round_up(n, m):
    return ((n + m - 1) // m) * m


def _lowrank_kv_kernel(x_ref, w_ref, k_ref, v_ref, *, num_heads, rank,
                       key_head_dim, value_head_dim, bk_off, bv_off,
                       ak_off, av_off):
    """One fused MXU matmul for all four projections, then the per-token rank
    contraction (torch.bmm) as an unrolled broadcast-MAC, stored head-by-head
    at static lane offsets."""
    nh, r, kd, vd = num_heads, rank, key_head_dim, value_head_dim

    x = x_ref[...]                                                  # (TM, H)
    # Fused projection, f32 accumulation on the MXU.
    fused = jnp.dot(x, w_ref[...], preferred_element_type=jnp.float32)

    # Section starts are all multiples of 128 (lane-aligned slices).
    B_k = fused[:, bk_off:bk_off + r * kd]      # (TM, r*kd)  rank-major, dim-minor
    B_v = fused[:, bv_off:bv_off + r * vd]      # (TM, r*vd)
    A_k = fused[:, ak_off:ak_off + nh * r]      # (TM, nh*r)  head-major (1/rank folded)
    A_v = fused[:, av_off:av_off + nh * r]      # (TM, nh*r)

    # k[t, h, d] = sum_r A_k[t, h*rank + r] * B_k[t, r*kd + d]
    # Store each head as soon as it is complete -> only one k and one v
    # accumulator live at any time (no vreg spills, no lane concatenate).
    for h in range(nh):
        base = h * r
        k_h = A_k[:, base:base + 1] * B_k[:, :kd]
        v_h = A_v[:, base:base + 1] * B_v[:, :vd]
        for rr in range(1, r):
            col = base + rr
            k_h = k_h + A_k[:, col:col + 1] * B_k[:, rr * kd:(rr + 1) * kd]
            v_h = v_h + A_v[:, col:col + 1] * B_v[:, rr * vd:(rr + 1) * vd]
        k_ref[:, h * kd:(h + 1) * kd] = k_h.astype(k_ref.dtype)
        v_ref[:, h * vd:(h + 1) * vd] = v_h.astype(v_ref.dtype)

    # Deterministic zeros in the lane padding (sliced off in the wrapper).
    if k_ref.shape[1] != nh * kd:
        k_ref[:, nh * kd:] = jnp.zeros(
            (k_ref.shape[0], k_ref.shape[1] - nh * kd), k_ref.dtype)
    if v_ref.shape[1] != nh * vd:
        v_ref[:, nh * vd:] = jnp.zeros(
            (v_ref.shape[0], v_ref.shape[1] - nh * vd), v_ref.dtype)


def make_low_rank_kv(w_key_a, w_value_a, w_key_b, w_value_b, *, num_heads,
                     rank, key_head_dim, value_head_dim, dtype=None,
                     tile_m=512):
    """Builds the fused weight once and returns `apply(x) -> (k, v)`.

    Weights are nn.Linear style, shape (out_features, hidden).  `dtype` is the
    compute dtype fed to the MXU (use jnp.bfloat16 on v6e/v7x for peak).
    """
    nh, r, kd, vd = num_heads, rank, key_head_dim, value_head_dim
    wka = jnp.asarray(w_key_a, jnp.float32)
    wva = jnp.asarray(w_value_a, jnp.float32)
    wkb = jnp.asarray(w_key_b, jnp.float32)
    wvb = jnp.asarray(w_value_b, jnp.float32)
    H = wka.shape[1]
    dt = dtype if dtype is not None else jnp.asarray(w_key_a).dtype
    isz = np.dtype(dt).itemsize

    # One-time fused weight: [ B_k | B_v | A_k/rank | A_v/rank ], each section
    # zero-padded to a multiple of 128 columns so in-kernel slices are aligned.
    inv_rank = 1.0 / float(rank)
    sections = [wkb.T, wvb.T, wka.T * inv_rank, wva.T * inv_rank]
    cols, offs, off = [], [], 0
    for sec in sections:
        offs.append(off)
        w = sec.shape[1]
        wp = _round_up(w, 128)
        sec = sec.astype(dt)
        if wp != w:
            sec = jnp.pad(sec, ((0, 0), (0, wp - w)))
        cols.append(sec)
        off += wp
    w_fused = jnp.concatenate(cols, axis=1)            # (H, n_pad)
    n_pad = off
    bk_off, bv_off, ak_off, av_off = offs

    # Lane-dense (multiple-of-128) output widths; padding sliced off outside.
    Wk = _round_up(nh * kd, 128)
    Wv = _round_up(nh * vd, 128)

    kernel = functools.partial(
        _lowrank_kv_kernel, num_heads=nh, rank=r, key_head_dim=kd,
        value_head_dim=vd, bk_off=bk_off, bv_off=bv_off, ak_off=ak_off,
        av_off=av_off)

    def _vmem_estimate(tm):
        return (2 * tm * H * isz          # x tile, double buffered
                + H * n_pad * isz         # fused weight, single buffered
                + tm * n_pad * 4          # f32 fused intermediate
                + 2 * tm * (Wk + Wv) * isz)  # outputs, double buffered

    def apply(x):
        B, S, Hx = x.shape
        assert Hx == H, "hidden size mismatch"
        M = B * S

        # Row tile: big (HBM-bound kernel), rounded to the dtype sublane pack.
        pack = {4: 8, 2: 16, 1: 32}.get(isz, 8)
        tm = _round_up(max(pack, min(tile_m, _round_up(M, pack))), pack)
        # Keep the per-step VMEM footprint under ~48 MiB (headroom on v7x's
        # 64 MiB physical VMEM).
        # TODO(synk): add an H-axis grid dimension (tile the hidden dim and
        # accumulate `fused` in an f32 scratch) for very large hidden sizes
        # where the resident (H, n_pad) weight alone exceeds the budget.
        while tm > pack and _vmem_estimate(tm) > (48 << 20):
            tm = _round_up(max(pack, tm // 2), pack)
        # Make sure there are >= 2 grid steps: shards across v7x's two
        # TensorCores and gives the input/output pipeline something to overlap.
        if _round_up(M, tm) // tm < 2:
            half = _round_up(max(pack, (M + 1) // 2), pack)
            if half < tm:
                tm = half
        M_pad = _round_up(M, tm)

        x_flat = x.reshape(M, H).astype(dt)
        if M_pad != M:
            x_flat = jnp.pad(x_flat, ((0, M_pad - M), (0, 0)))

        cost = pl.CostEstimate(
            flops=2 * M_pad * H * n_pad + 2 * M_pad * nh * r * (kd + vd),
            transcendentals=0,
            bytes_accessed=(M_pad * H + H * n_pad + M_pad * (Wk + Wv)) * isz)

        cparams = dict(dimension_semantics=("parallel",))
        est = _vmem_estimate(tm)
        if est > (32 << 20):
            cparams["vmem_limit_bytes"] = min(
                _round_up(est + (4 << 20), 1 << 20), 128 << 20)

        def run(w_spec):
            return pl.pallas_call(
                kernel,
                out_shape=(jax.ShapeDtypeStruct((M_pad, Wk), dt),
                           jax.ShapeDtypeStruct((M_pad, Wv), dt)),
                grid_spec=pltpu.PrefetchScalarGridSpec(
                    num_scalar_prefetch=0,
                    grid=(M_pad // tm,),
                    in_specs=[pl.BlockSpec((tm, H), lambda i: (i, 0)), w_spec],
                    out_specs=[pl.BlockSpec((tm, Wk), lambda i: (i, 0)),
                               pl.BlockSpec((tm, Wv), lambda i: (i, 0))],
                ),
                compiler_params=pltpu.CompilerParams(**cparams),
                cost_estimate=cost,
            )(x_flat, w_fused)

        try:
            # Weight block never changes across the grid -> single VMEM copy.
            k_flat, v_flat = run(
                pl.BlockSpec((H, n_pad), lambda i: (0, 0),
                             pipeline_mode=pl.Buffered(1)))
        except Exception:  # fall back to default double-buffered weight spec
            k_flat, v_flat = run(pl.BlockSpec((H, n_pad), lambda i: (0, 0)))

        k = k_flat[:M, :nh * kd].reshape(B, S, nh, kd)
        v = v_flat[:M, :nh * vd].reshape(B, S, nh, vd)
        return k, v

    return apply


def low_rank_key_value(x, w_key_a, w_value_a, w_key_b, w_value_b, **kwargs):
    """One-shot convenience wrapper.  For repeated calls, build the closure
    once with make_low_rank_kv (hoists the fused-weight prep)."""
    return make_low_rank_kv(w_key_a, w_value_a, w_key_b, w_value_b,
                            **kwargs)(x)


def _reference(x, w_key_a, w_value_a, w_key_b, w_value_b, *, num_heads, rank,
               key_head_dim, value_head_dim):
    """Pure-JAX replica of the PyTorch forward pass."""
    B, S, H = x.shape
    M = B * S
    xf = x.reshape(M, H)
    A_k = (xf @ w_key_a.T).reshape(M, num_heads, rank)
    A_v = (xf @ w_value_a.T).reshape(M, num_heads, rank)
    B_k = (xf @ w_key_b.T).reshape(M, rank, key_head_dim)
    B_v = (xf @ w_value_b.T).reshape(M, rank, value_head_dim)
    k = jnp.einsum('mhr,mrd->mhd', A_k, B_k) / rank
    v = jnp.einsum('mhr,mrd->mhd', A_v, B_v) / rank
    return (k.reshape(B, S, num_heads, key_head_dim),
            v.reshape(B, S, num_heads, value_head_dim))


if __name__ == "__main__":
    batch, seq, hidden = 2, 8, 32
    num_heads, key_head_dim, value_head_dim, rank = 4, 32, 16, 2

    key = jax.random.PRNGKey(0)
    kx, k1, k2, k3, k4 = jax.random.split(key, 5)

    x = jax.random.normal(kx, (batch, seq, hidden), dtype=jnp.float32)
    scale = 1.0 / np.sqrt(hidden)
    w_key_a = scale * jax.random.normal(k1, (num_heads * rank, hidden), jnp.float32)
    w_value_a = scale * jax.random.normal(k2, (num_heads * rank, hidden), jnp.float32)
    w_key_b = scale * jax.random.normal(k3, (rank * key_head_dim, hidden), jnp.float32)
    w_value_b = scale * jax.random.normal(k4, (rank * value_head_dim, hidden), jnp.float32)

    apply_fn = make_low_rank_kv(
        w_key_a, w_value_a, w_key_b, w_value_b,
        num_heads=num_heads, rank=rank,
        key_head_dim=key_head_dim, value_head_dim=value_head_dim)

    k_out, v_out = apply_fn(x)
    jax.block_until_ready((k_out, v_out))

    k_ref, v_ref = _reference(
        x, w_key_a, w_value_a, w_key_b, w_value_b,
        num_heads=num_heads, rank=rank,
        key_head_dim=key_head_dim, value_head_dim=value_head_dim)

    np.testing.assert_allclose(np.asarray(k_out), np.asarray(k_ref), rtol=1e-5, atol=1e-5)
    np.testing.assert_allclose(np.asarray(v_out), np.asarray(v_ref), rtol=1e-5, atol=1e-5)

    print("KERNEL_OK")
</pallas_src>

<mosaic_0001>
module attributes {stable_mosaic.version = 11 : i64} {
  func.func @_lowrank_kv_kernel(%arg0: i32, %arg1: memref<8x32xf32, #tpu.memory_space<vmem>>, %arg2: memref<32x512xf32, #tpu.memory_space<vmem>>, %arg3: memref<8x128xf32, #tpu.memory_space<vmem>>, %arg4: memref<8x128xf32, #tpu.memory_space<vmem>>) attributes {dimension_semantics = [#tpu.dimension_semantics<parallel>], iteration_bounds = array<i64: 2>, scalar_prefetch = 0 : i64, scratch_operands = 0 : i64, tpu.core_type = #tpu.core_type<tc>, window_params = [{transform_indices = @transform_0, window_bounds = array<i64: 8, 32>}, {pipeline_mode = #tpu.pipeline_mode<synchronous>, transform_indices = @transform_1, window_bounds = array<i64: 32, 512>}, {transform_indices = @transform_2, window_bounds = array<i64: 8, 128>}, {transform_indices = @transform_3, window_bounds = array<i64: 8, 128>}]} {
    %c0 = arith.constant 0 : index
    %c0_0 = arith.constant 0 : index
    %0 = vector.load %arg1[%c0, %c0_0] : memref<8x32xf32, #tpu.memory_space<vmem>>, vector<8x32xf32>
    %c0_1 = arith.constant 0 : index
    %c0_2 = arith.constant 0 : index
    %1 = vector.load %arg2[%c0_1, %c0_2] : memref<32x512xf32, #tpu.memory_space<vmem>>, vector<32x512xf32>
    %cst = arith.constant dense<0.000000e+00> : vector<8x512xf32>
    %2 = tpu.matmul %0, %1, %cst {dimension_numbers = #tpu.dot_dimension_numbers<[1], [0], [0], [1], [0, 0, 1, 1], [], []>} : vector<8x32xf32>, vector<32x512xf32>, vector<8x512xf32> -> vector<8x512xf32>
    %3 = vector.extract_strided_slice %2 {offsets = [0, 0], sizes = [8, 64], strides = [1, 1]} : vector<8x512xf32> to vector<8x64xf32>
    %4 = vector.extract_strided_slice %2 {offsets = [0, 128], sizes = [8, 32], strides = [1, 1]} : vector<8x512xf32> to vector<8x32xf32>
    %5 = vector.extract_strided_slice %2 {offsets = [0, 256], sizes = [8, 8], strides = [1, 1]} : vector<8x512xf32> to vector<8x8xf32>
    %6 = vector.extract_strided_slice %2 {offsets = [0, 384], sizes = [8, 8], strides = [1, 1]} : vector<8x512xf32> to vector<8x8xf32>
    %7 = vector.extract_strided_slice %5 {offsets = [0, 0], sizes = [8, 1], strides = [1, 1]} : vector<8x8xf32> to vector<8x1xf32>
    %8 = vector.extract_strided_slice %3 {offsets = [0, 0], sizes = [8, 32], strides = [1, 1]} : vector<8x64xf32> to vector<8x32xf32>
    %9 = vector.broadcast %7 : vector<8x1xf32> to vector<8x32xf32>
    %10 = arith.mulf %9, %8 : vector<8x32xf32>
    %11 = vector.extract_strided_slice %6 {offsets = [0, 0], sizes = [8, 1], strides = [1, 1]} : vector<8x8xf32> to vector<8x1xf32>
    %12 = vector.extract_strided_slice %4 {offsets = [0, 0], sizes = [8, 16], strides = [1, 1]} : vector<8x32xf32> to vector<8x16xf32>
    %13 = vector.broadcast %11 : vector<8x1xf32> to vector<8x16xf32>
    %14 = arith.mulf %13, %12 : vector<8x16xf32>
    %15 = vector.extract_strided_slice %5 {offsets = [0, 1], sizes = [8, 1], strides = [1, 1]} : vector<8x8xf32> to vector<8x1xf32>
    %16 = vector.extract_strided_slice %3 {offsets = [0, 32], sizes = [8, 32], strides = [1, 1]} : vector<8x64xf32> to vector<8x32xf32>
    %17 = vector.broadcast %15 : vector<8x1xf32> to vector<8x32xf32>
    %18 = arith.mulf %17, %16 : vector<8x32xf32>
    %19 = arith.addf %10, %18 : vector<8x32xf32>
    %20 = vector.extract_strided_slice %6 {offsets = [0, 1], sizes = [8, 1], strides = [1, 1]} : vector<8x8xf32> to vector<8x1xf32>
    %21 = vector.extract_strided_slice %4 {offsets = [0, 16], sizes = [8, 16], strides = [1, 1]} : vector<8x32xf32> to vector<8x16xf32>
    %22 = vector.broadcast %20 : vector<8x1xf32> to vector<8x16xf32>
    %23 = arith.mulf %22, %21 : vector<8x16xf32>
    %24 = arith.addf %14, %23 : vector<8x16xf32>
    %c0_3 = arith.constant 0 : index
    %c0_4 = arith.constant 0 : index
    %25 = vector.load %arg3[%c0_3, %c0_4] : memref<8x128xf32, #tpu.memory_space<vmem>>, vector<8x32xf32>
    tpu.vector_store %arg3[%c0_3, %c0_4], %19 {strides = array<i32>} : memref<8x128xf32, #tpu.memory_space<vmem>>, vector<8x32xf32>,
    %c0_5 = arith.constant 0 : index
    %c0_6 = arith.constant 0 : index
    %26 = vector.load %arg4[%c0_5, %c0_6] : memref<8x128xf32, #tpu.memory_space<vmem>>, vector<8x16xf32>
    tpu.vector_store %arg4[%c0_5, %c0_6], %24 {strides = array<i32>} : memref<8x128xf32, #tpu.memory_space<vmem>>, vector<8x16xf32>,
    %27 = vector.extract_strided_slice %5 {offsets = [0, 2], sizes = [8, 1], strides = [1, 1]} : vector<8x8xf32> to vector<8x1xf32>
    %28 = vector.extract_strided_slice %3 {offsets = [0, 0], sizes = [8, 32], strides = [1, 1]} : vector<8x64xf32> to vector<8x32xf32>
    %29 = vector.broadcast %27 : vector<8x1xf32> to vector<8x32xf32>
    %30 = arith.mulf %29, %28 : vector<8x32xf32>
    %31 = vector.extract_strided_slice %6 {offsets = [0, 2], sizes = [8, 1], strides = [1, 1]} : vector<8x8xf32> to vector<8x1xf32>
    %32 = vector.extract_strided_slice %4 {offsets = [0, 0], sizes = [8, 16], strides = [1, 1]} : vector<8x32xf32> to vector<8x16xf32>
    %33 = vector.broadcast %31 : vector<8x1xf32> to vector<8x16xf32>
    %34 = arith.mulf %33, %32 : vector<8x16xf32>
    %35 = vector.extract_strided_slice %5 {offsets = [0, 3], sizes = [8, 1], strides = [1, 1]} : vector<8x8xf32> to vector<8x1xf32>
    %36 = vector.extract_strided_slice %3 {offsets = [0, 32], sizes = [8, 32], strides = [1, 1]} : vector<8x64xf32> to vector<8x32xf32>
    %37 = vector.broadcast %35 : vector<8x1xf32> to vector<8x32xf32>
    %38 = arith.mulf %37, %36 : vector<8x32xf32>
    %39 = arith.addf %30, %38 : vector<8x32xf32>
    %40 = vector.extract_strided_slice %6 {offsets = [0, 3], sizes = [8, 1], strides = [1, 1]} : vector<8x8xf32> to vector<8x1xf32>
    %41 = vector.extract_strided_slice %4 {offsets = [0, 16], sizes = [8, 16], strides = [1, 1]} : vector<8x32xf32> to vector<8x16xf32>
    %42 = vector.broadcast %40 : vector<8x1xf32> to vector<8x16xf32>
    %43 = arith.mulf %42, %41 : vector<8x16xf32>
    %44 = arith.addf %34, %43 : vector<8x16xf32>
    %c0_7 = arith.constant 0 : index
    %c32 = arith.constant 32 : index
    %45 = vector.load %arg3[%c0_7, %c32] : memref<8x128xf32, #tpu.memory_space<vmem>>, vector<8x32xf32>
    tpu.vector_store %arg3[%c0_7, %c32], %39 {strides = array<i32>} : memref<8x128xf32, #tpu.memory_space<vmem>>, vector<8x32xf32>,
    %c0_8 = arith.constant 0 : index
    %c16 = arith.constant 16 : index
    %46 = vector.load %arg4[%c0_8, %c16] : memref<8x128xf32, #tpu.memory_space<vmem>>, vector<8x16xf32>
    tpu.vector_store %arg4[%c0_8, %c16], %44 {strides = array<i32>} : memref<8x128xf32, #tpu.memory_space<vmem>>, vector<8x16xf32>,
    %47 = vector.extract_strided_slice %5 {offsets = [0, 4], sizes = [8, 1], strides = [1, 1]} : vector<8x8xf32> to vector<8x1xf32>
    %48 = vector.extract_strided_slice %3 {offsets = [0, 0], sizes = [8, 32], strides = [1, 1]} : vector<8x64xf32> to vector<8x32xf32>
    %49 = vector.broadcast %47 : vector<8x1xf32> to vector<8x32xf32>
    %50 = arith.mulf %49, %48 : vector<8x32xf32>
    %51 = vector.extract_strided_slice %6 {offsets = [0, 4], sizes = [8, 1], strides = [1, 1]} : vector<8x8xf32> to vector<8x1xf32>
    %52 = vector.extract_strided_slice %4 {offsets = [0, 0], sizes = [8, 16], strides = [1, 1]} : vector<8x32xf32> to vector<8x16xf32>
    %53 = vector.broadcast %51 : vector<8x1xf32> to vector<8x16xf32>
    %54 = arith.mulf %53, %52 : vector<8x16xf32>
    %55 = vector.extract_strided_slice %5 {offsets = [0, 5], sizes = [8, 1], strides = [1, 1]} : vector<8x8xf32> to vector<8x1xf32>
    %56 = vector.extract_strided_slice %3 {offsets = [0, 32], sizes = [8, 32], strides = [1, 1]} : vector<8x64xf32> to vector<8x32xf32>
    %57 = vector.broadcast %55 : vector<8x1xf32> to vector<8x32xf32>
    %58 = arith.mulf %57, %56 : vector<8x32xf32>
    %59 = arith.addf %50, %58 : vector<8x32xf32>
    %60 = vector.extract_strided_slice %6 {offsets = [0, 5], sizes = [8, 1], strides = [1, 1]} : vector<8x8xf32> to vector<8x1xf32>
    %61 = vector.extract_strided_slice %4 {offsets = [0, 16], sizes = [8, 16], strides = [1, 1]} : vector<8x32xf32> to vector<8x16xf32>
    %62 = vector.broadcast %60 : vector<8x1xf32> to vector<8x16xf32>
    %63 = arith.mulf %62, %61 : vector<8x16xf32>
    %64 = arith.addf %54, %63 : vector<8x16xf32>
    %c0_9 = arith.constant 0 : index
    %c64 = arith.constant 64 : index
    %65 = vector.load %arg3[%c0_9, %c64] : memref<8x128xf32, #tpu.memory_space<vmem>>, vector<8x32xf32>
    tpu.vector_store %arg3[%c0_9, %c64], %59 {strides = array<i32>} : memref<8x128xf32, #tpu.memory_space<vmem>>, vector<8x32xf32>,
    %c0_10 = arith.constant 0 : index
    %c32_11 = arith.constant 32 : index
    %66 = vector.load %arg4[%c0_10, %c32_11] : memref<8x128xf32, #tpu.memory_space<vmem>>, vector<8x16xf32>
    tpu.vector_store %arg4[%c0_10, %c32_11], %64 {strides = array<i32>} : memref<8x128xf32, #tpu.memory_space<vmem>>, vector<8x16xf32>,
    %67 = vector.extract_strided_slice %5 {offsets = [0, 6], sizes = [8, 1], strides = [1, 1]} : vector<8x8xf32> to vector<8x1xf32>
    %68 = vector.extract_strided_slice %3 {offsets = [0, 0], sizes = [8, 32], strides = [1, 1]} : vector<8x64xf32> to vector<8x32xf32>
    %69 = vector.broadcast %67 : vector<8x1xf32> to vector<8x32xf32>
    %70 = arith.mulf %69, %68 : vector<8x32xf32>
    %71 = vector.extract_strided_slice %6 {offsets = [0, 6], sizes = [8, 1], strides = [1, 1]} : vector<8x8xf32> to vector<8x1xf32>
    %72 = vector.extract_strided_slice %4 {offsets = [0, 0], sizes = [8, 16], strides = [1, 1]} : vector<8x32xf32> to vector<8x16xf32>
    %73 = vector.broadcast %71 : vector<8x1xf32> to vector<8x16xf32>
    %74 = arith.mulf %73, %72 : vector<8x16xf32>
    %75 = vector.extract_strided_slice %5 {offsets = [0, 7], sizes = [8, 1], strides = [1, 1]} : vector<8x8xf32> to vector<8x1xf32>
    %76 = vector.extract_strided_slice %3 {offsets = [0, 32], sizes = [8, 32], strides = [1, 1]} : vector<8x64xf32> to vector<8x32xf32>
    %77 = vector.broadcast %75 : vector<8x1xf32> to vector<8x32xf32>
    %78 = arith.mulf %77, %76 : vector<8x32xf32>
    %79 = arith.addf %70, %78 : vector<8x32xf32>
    %80 = vector.extract_strided_slice %6 {offsets = [0, 7], sizes = [8, 1], strides = [1, 1]} : vector<8x8xf32> to vector<8x1xf32>
    %81 = vector.extract_strided_slice %4 {offsets = [0, 16], sizes = [8, 16], strides = [1, 1]} : vector<8x32xf32> to vector<8x16xf32>
    %82 = vector.broadcast %80 : vector<8x1xf32> to vector<8x16xf32>
    %83 = arith.mulf %82, %81 : vector<8x16xf32>
    %84 = arith.addf %74, %83 : vector<8x16xf32>
    %c0_12 = arith.constant 0 : index
    %c96 = arith.constant 96 : index
    %85 = vector.load %arg3[%c0_12, %c96] : memref<8x128xf32, #tpu.memory_space<vmem>>, vector<8x32xf32>
    tpu.vector_store %arg3[%c0_12, %c96], %79 {strides = array<i32>} : memref<8x128xf32, #tpu.memory_space<vmem>>, vector<8x32xf32>,
    %c0_13 = arith.constant 0 : index
    %c48 = arith.constant 48 : index
    %86 = vector.load %arg4[%c0_13, %c48] : memref<8x128xf32, #tpu.memory_space<vmem>>, vector<8x16xf32>
    tpu.vector_store %arg4[%c0_13, %c48], %84 {strides = array<i32>} : memref<8x128xf32, #tpu.memory_space<vmem>>, vector<8x16xf32>,
    %cst_14 = arith.constant 0.000000e+00 : f32
    %87 = vector.broadcast %cst_14 : f32 to vector<8x64xf32>
    %c0_15 = arith.constant 0 : index
    %c64_16 = arith.constant 64 : index
    %88 = vector.load %arg4[%c0_15, %c64_16] : memref<8x128xf32, #tpu.memory_space<vmem>>, vector<8x64xf32>
    tpu.vector_store %arg4[%c0_15, %c64_16], %87 {strides = array<i32>} : memref<8x128xf32, #tpu.memory_space<vmem>>, vector<8x64xf32>,
    return
  }
  func.func @transform_0(%arg0: i32) -> (i32, i32) {
    %c0_i32 = arith.constant 0 : i32
    %c0_i32_0 = arith.constant 0 : i32
    return %arg0, %c0_i32 : i32, i32
  }
  func.func @transform_1(%arg0: i32) -> (i32, i32) {
    %c0_i32 = arith.constant 0 : i32
    %c0_i32_0 = arith.constant 0 : i32
    %c0_i32_1 = arith.constant 0 : i32
    return %c0_i32, %c0_i32_0 : i32, i32
  }
  func.func @transform_2(%arg0: i32) -> (i32, i32) {
    %c0_i32 = arith.constant 0 : i32
    %c0_i32_0 = arith.constant 0 : i32
    return %arg0, %c0_i32 : i32, i32
  }
  func.func @transform_3(%arg0: i32) -> (i32, i32) {
    %c0_i32 = arith.constant 0 : i32
    %c0_i32_0 = arith.constant 0 : i32
    return %arg0, %c0_i32 : i32, i32
  }
}

module attributes {stable_mosaic.version = 11 : i64} {
  func.func @_lowrank_kv_kernel(%arg0: i32, %arg1: memref<8x32xf32, #tpu.memory_space<vmem>>, %arg2: memref<32x512xf32, #tpu.memory_space<vmem>>, %arg3: memref<8x128xf32, #tpu.memory_space<vmem>>, %arg4: memref<8x128xf32, #tpu.memory_space<vmem>>) attributes {dimension_semantics = [#tpu.dimension_semantics<parallel>], iteration_bounds = array<i64: 2>, scalar_prefetch = 0 : i64, scratch_operands = 0 : i64, tpu.core_type = #tpu.core_type<tc>, window_params = [{transform_indices = @transform_0, window_bounds = array<i64: 8, 32>}, {pipeline_mode = #tpu.pipeline_mode<synchronous>, transform_indices = @transform_1, window_bounds = array<i64: 32, 512>}, {transform_indices = @transform_2, window_bounds = array<i64: 8, 128>}, {transform_indices = @transform_3, window_bounds = array<i64: 8, 128>}]} {
    %c0 = arith.constant 0 : index
    %c0_0 = arith.constant 0 : index
    %0 = vector.load %arg1[%c0, %c0_0] : memref<8x32xf32, #tpu.memory_space<vmem>>, vector<8x32xf32>
    %c0_1 = arith.constant 0 : index
    %c0_2 = arith.constant 0 : index
    %1 = vector.load %arg2[%c0_1, %c0_2] : memref<32x512xf32, #tpu.memory_space<vmem>>, vector<32x512xf32>
    %cst = arith.constant dense<0.000000e+00> : vector<8x512xf32>
    %2 = tpu.matmul %0, %1, %cst {dimension_numbers = #tpu.dot_dimension_numbers<[1], [0], [0], [1], [0, 0, 1, 1], [], []>} : vector<8x32xf32>, vector<32x512xf32>, vector<8x512xf32> -> vector<8x512xf32>
    %3 = vector.extract_strided_slice %2 {offsets = [0, 0], sizes = [8, 64], strides = [1, 1]} : vector<8x512xf32> to vector<8x64xf32>
    %4 = vector.extract_strided_slice %2 {offsets = [0, 128], sizes = [8, 32], strides = [1, 1]} : vector<8x512xf32> to vector<8x32xf32>
    %5 = vector.extract_strided_slice %2 {offsets = [0, 256], sizes = [8, 8], strides = [1, 1]} : vector<8x512xf32> to vector<8x8xf32>
    %6 = vector.extract_strided_slice %2 {offsets = [0, 384], sizes = [8, 8], strides = [1, 1]} : vector<8x512xf32> to vector<8x8xf32>
    %7 = vector.extract_strided_slice %5 {offsets = [0, 0], sizes = [8, 1], strides = [1, 1]} : vector<8x8xf32> to vector<8x1xf32>
    %8 = vector.extract_strided_slice %3 {offsets = [0, 0], sizes = [8, 32], strides = [1, 1]} : vector<8x64xf32> to vector<8x32xf32>
    %9 = vector.broadcast %7 : vector<8x1xf32> to vector<8x32xf32>
    %10 = arith.mulf %9, %8 : vector<8x32xf32>
    %11 = vector.extract_strided_slice %6 {offsets = [0, 0], sizes = [8, 1], strides = [1, 1]} : vector<8x8xf32> to vector<8x1xf32>
    %12 = vector.extract_strided_slice %4 {offsets = [0, 0], sizes = [8, 16], strides = [1, 1]} : vector<8x32xf32> to vector<8x16xf32>
    %13 = vector.broadcast %11 : vector<8x1xf32> to vector<8x16xf32>
    %14 = arith.mulf %13, %12 : vector<8x16xf32>
    %15 = vector.extract_strided_slice %5 {offsets = [0, 1], sizes = [8, 1], strides = [1, 1]} : vector<8x8xf32> to vector<8x1xf32>
    %16 = vector.extract_strided_slice %3 {offsets = [0, 32], sizes = [8, 32], strides = [1, 1]} : vector<8x64xf32> to vector<8x32xf32>
    %17 = vector.broadcast %15 : vector<8x1xf32> to vector<8x32xf32>
    %18 = arith.mulf %17, %16 : vector<8x32xf32>
    %19 = arith.addf %10, %18 : vector<8x32xf32>
    %20 = vector.extract_strided_slice %6 {offsets = [0, 1], sizes = [8, 1], strides = [1, 1]} : vector<8x8xf32> to vector<8x1xf32>
    %21 = vector.extract_strided_slice %4 {offsets = [0, 16], sizes = [8, 16], strides = [1, 1]} : vector<8x32xf32> to vector<8x16xf32>
    %22 = vector.broadcast %20 : vector<8x1xf32> to vector<8x16xf32>
    %23 = arith.mulf %22, %21 : vector<8x16xf32>
    %24 = arith.addf %14, %23 : vector<8x16xf32>
    %c0_3 = arith.constant 0 : index
    %c0_4 = arith.constant 0 : index
    %25 = vector.load %arg3[%c0_3, %c0_4] : memref<8x128xf32, #tpu.memory_space<vmem>>, vector<8x32xf32>
    tpu.vector_store %arg3[%c0_3, %c0_4], %19 {strides = array<i32>} : memref<8x128xf32, #tpu.memory_space<vmem>>, vector<8x32xf32>,
    %c0_5 = arith.constant 0 : index
    %c0_6 = arith.constant 0 : index
    %26 = vector.load %arg4[%c0_5, %c0_6] : memref<8x128xf32, #tpu.memory_space<vmem>>, vector<8x16xf32>
    tpu.vector_store %arg4[%c0_5, %c0_6], %24 {strides = array<i32>} : memref<8x128xf32, #tpu.memory_space<vmem>>, vector<8x16xf32>,
    %27 = vector.extract_strided_slice %5 {offsets = [0, 2], sizes = [8, 1], strides = [1, 1]} : vector<8x8xf32> to vector<8x1xf32>
    %28 = vector.extract_strided_slice %3 {offsets = [0, 0], sizes = [8, 32], strides = [1, 1]} : vector<8x64xf32> to vector<8x32xf32>
    %29 = vector.broadcast %27 : vector<8x1xf32> to vector<8x32xf32>
    %30 = arith.mulf %29, %28 : vector<8x32xf32>
    %31 = vector.extract_strided_slice %6 {offsets = [0, 2], sizes = [8, 1], strides = [1, 1]} : vector<8x8xf32> to vector<8x1xf32>
    %32 = vector.extract_strided_slice %4 {offsets = [0, 0], sizes = [8, 16], strides = [1, 1]} : vector<8x32xf32> to vector<8x16xf32>
    %33 = vector.broadcast %31 : vector<8x1xf32> to vector<8x16xf32>
    %34 = arith.mulf %33, %32 : vector<8x16xf32>
    %35 = vector.extract_strided_slice %5 {offsets = [0, 3], sizes = [8, 1], strides = [1, 1]} : vector<8x8xf32> to vector<8x1xf32>
    %36 = vector.extract_strided_slice %3 {offsets = [0, 32], sizes = [8, 32], strides = [1, 1]} : vector<8x64xf32> to vector<8x32xf32>
    %37 = vector.broadcast %35 : vector<8x1xf32> to vector<8x32xf32>
    %38 = arith.mulf %37, %36 : vector<8x32xf32>
    %39 = arith.addf %30, %38 : vector<8x32xf32>
    %40 = vector.extract_strided_slice %6 {offsets = [0, 3], sizes = [8, 1], strides = [1, 1]} : vector<8x8xf32> to vector<8x1xf32>
    %41 = vector.extract_strided_slice %4 {offsets = [0, 16], sizes = [8, 16], strides = [1, 1]} : vector<8x32xf32> to vector<8x16xf32>
    %42 = vector.broadcast %40 : vector<8x1xf32> to vector<8x16xf32>
    %43 = arith.mulf %42, %41 : vector<8x16xf32>
    %44 = arith.addf %34, %43 : vector<8x16xf32>
    %c0_7 = arith.constant 0 : index
    %c32 = arith.constant 32 : index
    %45 = vector.load %arg3[%c0_7, %c32] : memref<8x128xf32, #tpu.memory_space<vmem>>, vector<8x32xf32>
    tpu.vector_store %arg3[%c0_7, %c32], %39 {strides = array<i32>} : memref<8x128xf32, #tpu.memory_space<vmem>>, vector<8x32xf32>,
    %c0_8 = arith.constant 0 : index
    %c16 = arith.constant 16 : index
    %46 = vector.load %arg4[%c0_8, %c16] : memref<8x128xf32, #tpu.memory_space<vmem>>, vector<8x16xf32>
    tpu.vector_store %arg4[%c0_8, %c16], %44 {strides = array<i32>} : memref<8x128xf32, #tpu.memory_space<vmem>>, vector<8x16xf32>,
    %47 = vector.extract_strided_slice %5 {offsets = [0, 4], sizes = [8, 1], strides = [1, 1]} : vector<8x8xf32> to vector<8x1xf32>
    %48 = vector.extract_strided_slice %3 {offsets = [0, 0], sizes = [8, 32], strides = [1, 1]} : vector<8x64xf32> to vector<8x32xf32>
    %49 = vector.broadcast %47 : vector<8x1xf32> to vector<8x32xf32>
    %50 = arith.mulf %49, %48 : vector<8x32xf32>
    %51 = vector.extract_strided_slice %6 {offsets = [0, 4], sizes = [8, 1], strides = [1, 1]} : vector<8x8xf32> to vector<8x1xf32>
    %52 = vector.extract_strided_slice %4 {offsets = [0, 0], sizes = [8, 16], strides = [1, 1]} : vector<8x32xf32> to vector<8x16xf32>
    %53 = vector.broadcast %51 : vector<8x1xf32> to vector<8x16xf32>
    %54 = arith.mulf %53, %52 : vector<8x16xf32>
    %55 = vector.extract_strided_slice %5 {offsets = [0, 5], sizes = [8, 1], strides = [1, 1]} : vector<8x8xf32> to vector<8x1xf32>
    %56 = vector.extract_strided_slice %3 {offsets = [0, 32], sizes = [8, 32], strides = [1, 1]} : vector<8x64xf32> to vector<8x32xf32>
    %57 = vector.broadcast %55 : vector<8x1xf32> to vector<8x32xf32>
    %58 = arith.mulf %57, %56 : vector<8x32xf32>
    %59 = arith.addf %50, %58 : vector<8x32xf32>
    %60 = vector.extract_strided_slice %6 {offsets = [0, 5], sizes = [8, 1], strides = [1, 1]} : vector<8x8xf32> to vector<8x1xf32>
    %61 = vector.extract_strided_slice %4 {offsets = [0, 16], sizes = [8, 16], strides = [1, 1]} : vector<8x32xf32> to vector<8x16xf32>
    %62 = vector.broadcast %60 : vector<8x1xf32> to vector<8x16xf32>
    %63 = arith.mulf %62, %61 : vector<8x16xf32>
    %64 = arith.addf %54, %63 : vector<8x16xf32>
    %c0_9 = arith.constant 0 : index
    %c64 = arith.constant 64 : index
    %65 = vector.load %arg3[%c0_9, %c64] : memref<8x128xf32, #tpu.memory_space<vmem>>, vector<8x32xf32>
    tpu.vector_store %arg3[%c0_9, %c64], %59 {strides = array<i32>} : memref<8x128xf32, #tpu.memory_space<vmem>>, vector<8x32xf32>,
    %c0_10 = arith.constant 0 : index
    %c32_11 = arith.constant 32 : index
    %66 = vector.load %arg4[%c0_10, %c32_11] : memref<8x128xf32, #tpu.memory_space<vmem>>, vector<8x16xf32>
    tpu.vector_store %arg4[%c0_10, %c32_11], %64 {strides = array<i32>} : memref<8x128xf32, #tpu.memory_space<vmem>>, vector<8x16xf32>,
    %67 = vector.extract_strided_slice %5 {offsets = [0, 6], sizes = [8, 1], strides = [1, 1]} : vector<8x8xf32> to vector<8x1xf32>
    %68 = vector.extract_strided_slice %3 {offsets = [0, 0], sizes = [8, 32], strides = [1, 1]} : vector<8x64xf32> to vector<8x32xf32>
    %69 = vector.broadcast %67 : vector<8x1xf32> to vector<8x32xf32>
    %70 = arith.mulf %69, %68 : vector<8x32xf32>
    %71 = vector.extract_strided_slice %6 {offsets = [0, 6], sizes = [8, 1], strides = [1, 1]} : vector<8x8xf32> to vector<8x1xf32>
    %72 = vector.extract_strided_slice %4 {offsets = [0, 0], sizes = [8, 16], strides = [1, 1]} : vector<8x32xf32> to vector<8x16xf32>
    %73 = vector.broadcast %71 : vector<8x1xf32> to vector<8x16xf32>
    %74 = arith.mulf %73, %72 : vector<8x16xf32>
    %75 = vector.extract_strided_slice %5 {offsets = [0, 7], sizes = [8, 1], strides = [1, 1]} : vector<8x8xf32> to vector<8x1xf32>
    %76 = vector.extract_strided_slice %3 {offsets = [0, 32], sizes = [8, 32], strides = [1, 1]} : vector<8x64xf32> to vector<8x32xf32>
    %77 = vector.broadcast %75 : vector<8x1xf32> to vector<8x32xf32>
    %78 = arith.mulf %77, %76 : vector<8x32xf32>
    %79 = arith.addf %70, %78 : vector<8x32xf32>
    %80 = vector.extract_strided_slice %6 {offsets = [0, 7], sizes = [8, 1], strides = [1, 1]} : vector<8x8xf32> to vector<8x1xf32>
    %81 = vector.extract_strided_slice %4 {offsets = [0, 16], sizes = [8, 16], strides = [1, 1]} : vector<8x32xf32> to vector<8x16xf32>
    %82 = vector.broadcast %80 : vector<8x1xf32> to vector<8x16xf32>
    %83 = arith.mulf %82, %81 : vector<8x16xf32>
    %84 = arith.addf %74, %83 : vector<8x16xf32>
    %c0_12 = arith.constant 0 : index
    %c96 = arith.constant 96 : index
    %85 = vector.load %arg3[%c0_12, %c96] : memref<8x128xf32, #tpu.memory_space<vmem>>, vector<8x32xf32>
    tpu.vector_store %arg3[%c0_12, %c96], %79 {strides = array<i32>} : memref<8x128xf32, #tpu.memory_space<vmem>>, vector<8x32xf32>,
    %c0_13 = arith.constant 0 : index
    %c48 = arith.constant 48 : index
    %86 = vector.load %arg4[%c0_13, %c48] : memref<8x128xf32, #tpu.memory_space<vmem>>, vector<8x16xf32>
    tpu.vector_store %arg4[%c0_13, %c48], %84 {strides = array<i32>} : memref<8x128xf32, #tpu.memory_space<vmem>>, vector<8x16xf32>,
    %cst_14 = arith.constant 0.000000e+00 : f32
    %87 = vector.broadcast %cst_14 : f32 to vector<8x64xf32>
    %c0_15 = arith.constant 0 : index
    %c64_16 = arith.constant 64 : index
    %88 = vector.load %arg4[%c0_15, %c64_16] : memref<8x128xf32, #tpu.memory_space<vmem>>, vector<8x64xf32>
    tpu.vector_store %arg4[%c0_15, %c64_16], %87 {strides = array<i32>} : memref<8x128xf32, #tpu.memory_space<vmem>>, vector<8x64xf32>,
    return
  }
  func.func @transform_0(%arg0: i32) -> (i32, i32) {
    %c0_i32 = arith.constant 0 : i32
    %c0_i32_0 = arith.constant 0 : i32
    return %arg0, %c0_i32 : i32, i32
  }
  func.func @transform_1(%arg0: i32) -> (i32, i32) {
    %c0_i32 = arith.constant 0 : i32
    %c0_i32_0 = arith.constant 0 : i32
    %c0_i32_1 = arith.constant 0 : i32
    return %c0_i32, %c0_i32_0 : i32, i32
  }
  func.func @transform_2(%arg0: i32) -> (i32, i32) {
    %c0_i32 = arith.constant 0 : i32
    %c0_i32_0 = arith.constant 0 : i32
    return %arg0, %c0_i32 : i32, i32
  }
  func.func @transform_3(%arg0: i32) -> (i32, i32) {
    %c0_i32 = arith.constant 0 : i32
    %c0_i32_0 = arith.constant 0 : i32
    return %arg0, %c0_i32 : i32, i32
  }
}

</mosaic_0001>

<bundles_post_ra>
// kernel: tpu_custom_call.1
= control target key start
LH: loop header
LB: loop body
LE: loop exit
PB: predicated region body
PF: predicated region fallthrough
CT: control target
= control target key end

     0   :  { %9 = vsyncpa [#allocation3], 0  ;;  %s1231_s0 = inlined_call_operand.hbm [shape: f32[16,32], index: 0, kind: input, shape index: {}]   ;;  %s1232_s1 = inlined_call_operand.hbm [shape: f32[32,512], index: 1, kind: input, shape index: {}]   ;;  %s1233_s2 = inlined_call_operand.hbm [shape: f32[16,128], index: 2, kind: output, shape index: {0}]   ;;  %s1234_s3 = inlined_call_operand.hbm [shape: f32[16,128], index: 3, kind: output, shape index: {1}]  }
   0x1   :  { %11 = vsyncpa [#allocation3 + $0x1], 0 }
   0x2   :  { %12 = vsyncpa [#allocation6], 0 }
   0x3   :  { %13 = vsyncpa [#allocation4], 0 }
   0x4   :  { %15 = vsyncpa [#allocation4 + $0x1], 0 }
   0x5   :  { %16 = vsyncpa [#allocation9], 0 }
   0x6   :  { %18 = vsyncpa [#allocation9 + $0x1], 0  ;;  %s990_s12 = smov 0   ;;  %s992_s13 = smov 0  }
   0x7   :  { %s994_s14 = smov 0   ;;  %s996_s15 = smov 0  }
   0x8 LB: > { %s1011_s16 = sadd.s32 4294967295, %s947_s15   ;;  %s682_s17 = sadd.s32 4294967294, %s947_s15   ;;  %s947_s15 = sphi %s996_s15, %s1256_s15   ;;  %s943_s14 = sphi %s994_s14, %s1255_s14   ;;  %s939_s13 = sphi %s992_s13, %s1254_s13   ;;  %s935_s12 = sphi %s990_s12, %s1253_s12  }
   0x9   : > { %p44_p0 = scmp.ne.s32.totalorder %s939_s13, %s935_s12  ;;  %p1235_p1 = scmp.eq.s32.totalorder %s1011_s16, 0 }
   0xa   : > { %p95_p3 = scmp.eq.s32.totalorder %s682_s17, 1  ;;  %p683_p5 = scmp.ge.s32.totalorder %s947_s15, 1 }
   0xb   : > { %p1020_p4 = por %p1235_p1, %p44_p0  ;;  %p128_p7 = scmp.lt.s32.totalorder %s947_s15, 3 }
   0xc   : > { %p1025_p6 = por %p95_p3, %p44_p0  ;;  %s949_s21 = smov [#allocation5]  }
   0xd   : > { %s1239_s18 = scalar_select %p1020_p4, 1, 0 }
   0xe   : > { %s1240_s19 = scalar_select %p1025_p6, 1, 0 }
   0xf   : > { %p1030_p8 = pnand %p683_p5, %p128_p7  ;;  %s140_s22 = sshll.u32 %s949_s21, 4  ;;  %s141_s22 = int_to_ptr.vmem [resolvable:$true] %s140_s22 }
  0x10   : > { %s1044_s24 = sadd.s32 1, %s947_s15   ;;  %s31_s25 = sadd.s32 1, %s943_s14 }
  0x11   : > { %s1241_s20 = scalar_select %p1030_p8, 1, 0 }
  0x12   : > { %p711_p9 = pneg %p1030_p8  ;;  %s28_s26 = ssub.s32 %s947_s15, %s1044_s24 }
  0x13   : > { %s806_s27 = scalar_lea.vmem %s141_s22, 2048  ;;  %p814_p5 = scmp.lt.s32.totalorder %s141_s22, %s141_s22 }
  0x14   : > { %p1039_p11 = pnand %p711_p9, %p1235_p1  ;;  %p807_p13 = scmp.ne.s32.totalorder %s141_s22, %s806_s27 }
  0x15   : > { %p815_p7 = scmp.lt.s32.totalorder %s806_s27, %s806_s27 }
  0x16   : > { %p797_p12 = pneg %p1039_p11 }
  0x17   : > { %p816_p10 = por %p815_p7, %p814_p5 }
  0x18   : > { %p809_p0 = pnand %p807_p13, %p797_p12 }
  0x1a   : > { %p810_p3 = pneg %p809_p0 }
  0x1c   : > { %p817_p2 = pnand %p816_p10, %p810_p3 }
  0x1e   : > { %820 = shalt.err (!%p817_p2)
}
  0x1f   : > { %s950_s28 = smov 512   ;;  %s951_s29 = smov 32  }
  0x20   : > { %714 = dma.hbm_to_vmem [thread:$0]  (!%p1039_p11), %s1232_s1, 2048, %s141_s22, [#allocation6], %s950_s28, %s950_s28, %s951_s29  }
  0x21   : > { %p29_p9 = scmp.eq.s32.totalorder %s28_s26, 0  ;;  %p38_p12 = scmp.ne.s32.totalorder %s943_s14, %s939_s13 }
  0x22   : > { %p39_p10 = scmp.eq.s32.totalorder %s947_s15, 0  ;;  %p727_p2 = scmp.lt.s32.totalorder %s947_s15, 2 }
  0x23   : > { %s1061_s5 = scalar_select %p29_p9, %s943_s14, %s31_s25  }
  0x24   : > { %p40_p13 = por %p39_p10, %p38_p12  ;;  %p1243_p0 = scmp.eq.s32.totalorder %s1011_s16, 1 }
  0x25   : > { %s154_s7 = sand.u32 1, %s943_s14   ;;  %s687_s8 = sshll.u32 %s947_s15, 7 }
  0x26   : > { %p1065_p3 = por %p1243_p0, %p38_p12  ;;  %s686_s9 = sshll.u32 %s154_s7, 3 }
  0x27   : > { %s1074_s17 = scalar_lea.hbm %s1231_s0, %s687_s8  ;;  %s158_s21 = scalar_lea.vmem [#allocation2], %s686_s9 }
  0x28   : > { %s1244_s6 = scalar_select %p1065_p3, 1, 0 }
  0x29   : > { %s165_s22 = sshll.u32 %s158_s21, 4  ;;  %p1076_p11 = pnand %p727_p2, %p40_p13  ;;  %s166_s22 = int_to_ptr.vmem [resolvable:$true] %s165_s22 }
  0x2a   : > { %s155_s25 = scalar_lea.sflag [#allocation3], %s154_s7  ;;  %s821_s26 = scalar_lea.hbm %s1074_s17, 128 }
  0x2b   : > { %p822_p5 = scmp.ne.s32.totalorder %s1074_s17, %s821_s26  ;;  %p823_p7 = pneg %p1076_p11 }
  0x2c   : > { %s826_s29 = scalar_lea.hbm %s1231_s0, 256  ;;  %p827_p10 = scmp.lt.s32.totalorder %s1074_s17, %s1231_s0 }
  0x2d   : > { %p824_p9 = pnand %p823_p7, %p822_p5  ;;  %p828_p2 = scmp.lt.s32.totalorder %s826_s29, %s821_s26 }
  0x2f   : > { %p825_p12 = pneg %p824_p9  ;;  %p829_p13 = por %p828_p2, %p827_p10 }
  0x31   : > { %p830_p0 = pnand %p829_p13, %p825_p12 }
  0x33   : > { %833 = shalt.err (!%p830_p0)
}
  0x34   : > { %s834_s8 = scalar_lea.vmem %s166_s22, 128  ;;  %s952_s7 = smov [#allocation2]  }
  0x35   : > { %p835_p1 = scmp.ne.s32.totalorder %s166_s22, %s834_s8  ;;  %s839_s9 = sshll.u32 %s952_s7, 4  ;;  %s840_s9 = int_to_ptr.vmem [resolvable:$false] %s839_s9 }
  0x36   : > { %s841_s10 = scalar_lea.vmem %s840_s9, 256  ;;  %p842_p5 = scmp.lt.s32.totalorder %s166_s22, %s840_s9 }
  0x37   : > { %p837_p6 = pnand %p835_p1, %p823_p7  ;;  %p843_p9 = scmp.lt.s32.totalorder %s841_s10, %s834_s8 }
  0x39   : > { %p838_p3 = pneg %p837_p6  ;;  %p844_p4 = por %p843_p9, %p842_p5 }
  0x3b   : > { %p845_p8 = pnand %p844_p4, %p838_p3 }
  0x3d   : > { %848 = shalt.err (!%p845_p8)
}
  0x3e   : > { %718 = dma.hbm_to_vmem [thread:$0]  (!%p1076_p11), %s1074_s17, 128, %s166_s22, %s155_s25  }
  0x3f   : > { %p1246_p12 = scmp.ne.s32.totalorder %s1241_s20, 0 }
  0x40   : > { %s1097_s11 = sand.u32 (!%p1246_p12), 1, %s939_s13   ;;  %p1247_p1 = scmp.ne.s32.totalorder (!%p1246_p12), %s1239_s18, 0 }
  0x41   : > { %174 = sbr.rel (%p1246_p12) target bundleno = 684 (0x2ac), region = 28  ;;  %s1100_s21 = sshll.u32 (!%p1246_p12), %s1097_s11, 3 }
  0x42   : > { %s177_s26 = scalar_lea.sflag (!%p1246_p12), [#allocation3], %s1097_s11  ;;  %s180_s27 = scalar_lea.vmem (!%p1246_p12), [#allocation2], %s1100_s21 }
  0x46   : > { %918 = dma.done.wait (%p1247_p1), %s177_s26, 128  }
  0x47   : > { %920 = vsyncadd (%p1247_p1), %s177_s26, 4294967168  ;;  %p1248_p4 = scmp.eq.s32.totalorder %s1011_s16, 0 }
  0x49   : > { %922 = dma.done.wait (%p1248_p4), [#allocation6], 2048   ;;  %p1249_p6 = pmov %p1248_p4 }
  0x4a   : > { %v953_v0 = vmov 0.0   ;;  %v954_v1 = vmov 5   ;;  %v955_v2 = vmov 3   ;;  %v228_v3 = vld [vmem:[#allocation5 + $0x78] sm:$0xff]  ;;  %v227_v4 = vld [vmem:[#allocation5 + $0x70] sm:$0xff]  ;;  %v226_v9 = vld [vmem:[#allocation5 + $0x68] sm:$0xff] }
  0x4b   : > { %924 = vsyncadd (%p1249_p6), [#allocation6], 4294965248  ;;  %368 = vmatprep.mubr.f32.mxu1 %v953_v0  ;;  %297 = vmatprep.mubr.f32.mxu0 %v953_v0  ;;  %v224_v5 = vld [vmem:[#allocation5 + $0x58] sm:$0xff]  ;;  %v223_v6 = vld [vmem:[#allocation5 + $0x50] sm:$0xff]  ;;  %vm229_vm0 = vcmask 261120   ;;  %v956_v22 = vmov 7  }
  0x4c   : > { %781 = vset.pattern.permute.xlu1 %v954_v1  ;;  %780 = vset.pattern.permute.xlu0 %v955_v2  ;;  %v220_v7 = vld [vmem:[#allocation5 + $0x38] sm:$0xff]  ;;  %v219_v8 = vld [vmem:[#allocation5 + $0x30] sm:$0xff]  ;;  %v225_v10 = vld [vmem:[#allocation5 + $0x60] sm:$0xff]  ;;  %v957_v23 = vmov 2   ;;  %v958_v24 = vmov 1   ;;  %v959_v25 = vmov 4  }
  0x4d   : > { %328 = vmatprep.subr.mxu1 %v228_v3  ;;  %v222_v11 = vld [vmem:[#allocation5 + $0x48] sm:$0xff]  ;;  %v216_v12 = vld [vmem:[#allocation5 + $0x18] sm:$0xff]  ;;  %257 = vmatprep.subr.mxu0 %v226_v9  ;;  %v221_v13 = vld [vmem:[#allocation5 + $0x40] sm:$0xff]  ;;  %v960_v26 = vmov 6   ;;  %v961_v27 = vmov 0   ;;  %s962_s18 = smov 96  }
  0x4e   : > { %329 = vmatpush1.msra.mxu1 %v227_v4  ;;  %v215_v14 = vld [vmem:[#allocation5 + $0x10] sm:$0xff]  ;;  %258 = vmatpush1.msra.mxu0 %v225_v10  ;;  %v218_v15 = vld [vmem:[#allocation5 + $0x28] sm:$0xff]  ;;  %v217_v17 = vld [vmem:[#allocation5 + $0x20] sm:$0xff]  ;;  %s963_s20 = smov 112   ;;  %s964_s17 = smov 32   ;;  %vm408_vm1 = vcmask 130048  }
  0x4f   : > { %330 = vmatprep.subr.mxu1 %v224_v5  ;;  %v212_v16 = vld [vmem:[%s180_s27] sm:$0xff]  ;;  %259 = vmatprep.subr.mxu0 %v222_v11  ;;  %v214_v18 = vld [vmem:[#allocation5 + $0x8] sm:$0xff]  ;;  %v213_v19 = vld [vmem:[#allocation5] sm:$0xff]  ;;  %s965_s22 = smov 64   ;;  %s966_s23 = smov 16   ;;  %vm444_vm2 = vcmask 523520  }
  0x50   : > { %331 = vmatpush1.msra.mxu1 %v223_v6  ;;  %260 = vmatpush1.msra.mxu0 %v221_v13  ;;  %s967_s25 = smov 48   ;;  %s204_s28 = scalar_lea.vmem [#allocation7], %s1100_s21  ;;  %vm486_vm3 = vcmask 785920   ;;  %vm450_vm4 = vcmask 261248   ;;  %vm492_vm5 = vcmask 392448   ;;  %vm528_vm6 = vcmask 1048320  }
  0x51   : > { %332 = vmatprep.subr.mxu1 %v220_v7  ;;  %261 = vmatprep.subr.mxu0 %v218_v15  ;;  %s1146_s29 = scalar_lea.vmem [#allocation8], %s1100_s21  ;;  %s697_s30 = sshll.u32 %s1011_s16, 7  ;;  %vm534_vm7 = vcmask 523648  }
  0x52   : > { %333 = vmatpush1.msra.mxu1 %v219_v8  ;;  %262 = vmatpush1.msra.mxu0 %v217_v17  ;;  %s557_s4 = sshll.u32 %s204_s28, 4  ;;  %s1156_s9 = scalar_lea.hbm %s1233_s2, %s697_s30  ;;  %s1158_s4 = int_to_ptr.vmem [resolvable:$true] %s557_s4 }
  0x53   : > { %334 = vmatprep.subr.mxu1 %v216_v12  ;;  %263 = vmatprep.subr.mxu0 %v214_v18  ;;  %s570_s10 = sshll.u32 %s1146_s29, 4  ;;  %s539_s21 = scalar_lea.sflag [#allocation4], %s1097_s11  ;;  %s571_s10 = int_to_ptr.vmem [resolvable:$true] %s570_s10 }
  0x54   : > { %335 = vmatpush1.msra.mxu1 %v215_v14  ;;  %264 = vmatpush1.msra.mxu0 %v213_v19  ;;  %s849_s26 = scalar_lea.vmem %s1158_s4, 128  ;;  %p1250_p3 = scmp.ne.s32.totalorder %s1244_s6, 0 }
  0x55   : > { %694 = vmatmul.mubr.msk.f32.vlgmr.msra.gmra.mxu1 %vm229_vm0, %v212_v16  ;;  %693 = vmatmul.mubr.msk.f32.vlgmr.msra.gmra.mxu0 %vm229_vm0, %v212_v16  ;;  %p850_p8 = scmp.ne.s32.totalorder %s1158_s4, %s849_s26  ;;  %s968_s27 = smov [#allocation7]  }
  0x57   : > { %p851_p11 = pnand %p850_p8, %p1250_p3 }
  0x59   : > { %p852_p7 = pneg %p851_p11 }
 0x115   : > { %v370_v20 = vpop.f32.mrf.mxu1  ;;  %v1118_v28 = vpop.f32.mrf.mxu0 }
 0x116   : > { %463 = vperm.xlu1 %781, %v370_v20   ;;  %421 = vperm.xlu0 %780, %v370_v20  }
 0x117   : > { %v372_v21 = vpop.f32.mrf.mxu1  ;;  %v1121_v32 = vpop.f32.mrf.mxu0 }
 0x11a   : > { %473 = vperm.xlu1 %781, %v372_v21   ;;  %431 = vperm.xlu0 %780, %v372_v21  }
 0x11e   : > { %783 = vset.pattern.permute.xlu1 %v956_v22  ;;  %782 = vset.pattern.permute.xlu0 %v956_v22 }
 0x11f   : > { %505 = vperm.xlu1 %783, %v370_v20   ;;  %515 = vperm.xlu0 %782, %v372_v21  }
 0x123   : > { %785 = vset.pattern.permute.xlu1 %v957_v23  ;;  %784 = vset.pattern.permute.xlu0 %v958_v24 }
 0x124   : > { %411 = vperm.xlu1 %785, %v370_v20   ;;  %388 = vperm.xlu0 %784, %v370_v20  }
 0x128   : > { %786 = vset.pattern.permute.xlu1 %v959_v25  ;;  %787 = vset.pattern.permute.xlu0 %v960_v26 }
 0x129   : > { %453 = vperm.xlu1 %786, %v370_v20   ;;  %495 = vperm.xlu0 %787, %v370_v20  }
 0x12d   : > { %788 = vset.pattern.permute.xlu1 %v958_v24  ;;  %790 = vset.pattern.permute.xlu0 %v959_v25 }
 0x12e   : > { %398 = vperm.xlu1 %788, %v372_v21   ;;  %458 = vperm.xlu0 %790, %v372_v21  }
 0x132   : > { %789 = vset.pattern.permute.xlu1 %v957_v23  ;;  %792 = vset.pattern.permute.xlu0 %v961_v27 }
 0x133   : > { %416 = vperm.xlu1 %789, %v372_v21  }
 0x137   : > { %791 = vset.pattern.permute.xlu1 %v960_v26 }
 0x138   : > { %500 = vperm.xlu1 %791, %v372_v21  }
 0x13c   : > { %793 = vset.pattern.permute.xlu1 %v961_v27 }
 0x191   : > { %v464_v29 = vpop.permute.xlu1 %463  ;;  %v422_v30 = vpop.permute.xlu0 %421 }
 0x192   : > { %v424_v31 = vmul.f32 %v422_v30, %v1118_v28  ;;  %v466_v35 = vmul.f32 %v464_v29, %v1118_v28 }
 0x194   : > { %426 = vrot.lane.b32.xlu1 %v424_v31, %s962_s18 }
 0x195   : > { %v474_v33 = vpop.permute.xlu1 %473  ;;  %v432_v34 = vpop.permute.xlu0 %431 }
 0x196   : > { %v476_v36 = vmul.f32 %v474_v33, %v1121_v32  ;;  %v434_v37 = vmul.f32 %v432_v34, %v1121_v32 }
 0x198   : > { %468 = vrot.lane.b32.xlu1 %v466_v35, %s962_s18  ;;  %478 = vrot.lane.b32.xlu0 %v476_v36, %s963_s20 }
 0x19a   : > { %v506_v38 = vpop.permute.xlu1 %505  ;;  %v516_v39 = vpop.permute.xlu0 %515 }
 0x19b   : > { %v518_v40 = vmul.f32 %v516_v39, %v1121_v32  ;;  %v508_v41 = vmul.f32 %v506_v38, %v1118_v28 }
 0x19c   : > { %436 = vrot.lane.b32.xlu1 %v434_v37, %s963_s20 }
 0x19d   : > { %520 = vrot.lane.b32.xlu0 %v518_v40, %s963_s20 }
 0x19f   : > { %v412_v42 = vpop.permute.xlu1 %411  ;;  %v389_v43 = vpop.permute.xlu0 %388 }
 0x1a0   : > { %510 = vrot.lane.b32.xlu1 %v508_v41, %s962_s18  ;;  %v391_v44 = vmul.f32 %v389_v43, %v1118_v28  ;;  %v414_v51 = vmul.f32 %v412_v42, %v1118_v28 }
 0x1a1   : > { %383 = vperm.xlu0 %792, %v372_v21  }
 0x1a4   : > { %v454_v45 = vpop.permute.xlu1 %453  ;;  %377 = vperm.xlu1 %793, %v370_v20   ;;  %v496_v50 = vpop.permute.xlu0 %495 }
 0x1a5   : > { %393 = vrot.lane.b32.xlu0 %v391_v44, %s962_s18  ;;  %v456_v54 = vmul.f32 %v454_v45, %v1118_v28  ;;  %v498_v62 = vmul.f32 %v496_v50, %v1118_v28 }
 0x1a6   : > { %794 = vset.pattern.permute.xlu0 %v956_v22 }
 0x1a9   : > { %v399_v46 = vpop.permute.xlu1 %398  ;;  %v459_v55 = vpop.permute.xlu0 %458 }
 0x1aa   : > { %v401_v47 = vmul.f32 %v399_v46, %v1121_v32  ;;  %v461_v63 = vmul.f32 %v459_v55, %v1121_v32 }
 0x1ac   : > { %403 = vrot.lane.b32.xlu1 %v401_v47, %s963_s20 }
 0x1ae   : > { %v417_v48 = vpop.permute.xlu1 %416 }
 0x1af   : > { %v419_v58 = vmul.f32 %v417_v48, %v1121_v32 }
 0x1b3   : > { %v501_v49 = vpop.permute.xlu1 %500 }
 0x1b4   : > { %v503_v5 = vmul.f32 %v501_v49, %v1121_v32 }
 0x206   : > { %v427_v52 = vpop.permute.xlu1 %426 }
 0x207   : > { %v429_v53 = vadd.f32 %v427_v52, %v414_v51 }
 0x209   : > { %441 = vrot.lane.b32.xlu0 %v429_v53, %s964_s17 }
 0x20a   : > { %v469_v56 = vpop.permute.xlu1 %468  ;;  %v479_v59 = vpop.permute.xlu0 %478 }
 0x20b   : > { %v471_v57 = vadd.f32 %v469_v56, %v456_v54  ;;  %v481_v2 = vadd.f32 %v479_v59, %v461_v63 }
 0x20d   : > { %483 = vrot.lane.b32.xlu0 %v471_v57, %s965_s22 }
 0x20e   : > { %v437_v60 = vpop.permute.xlu1 %436 }
 0x20f   : > { %v439_v61 = vadd.f32 %v437_v60, %v419_v58  ;;  %v521_v4 = vpop.permute.xlu0 %520 }
 0x210   : > { %v523_v6 = vadd.f32 %v521_v4, %v503_v5 }
 0x211   : > { %447 = vrot.lane.b32.xlu1 %v439_v61, %s966_s23 }
 0x212   : > { %v511_v1 = vpop.permute.xlu1 %510 }
 0x213   : > { %v513_v3 = vadd.f32 %v511_v1, %v498_v62 }
 0x215   : > { %525 = vrot.lane.b32.xlu0 %v513_v3, %s962_s18  ;;  %489 = vrot.lane.b32.xlu1 %v481_v2, %s964_s17  ;;  %s853_s18 = sshll.u32 %s968_s27, 4  ;;  %s854_s18 = int_to_ptr.vmem [resolvable:$false] %s853_s18 }
 0x216   : > { %s855_s20 = scalar_lea.vmem %s854_s18, 256  ;;  %p856_p10 = scmp.lt.s32.totalorder %s1158_s4, %s854_s18 }
 0x217   : > { %p857_p2 = scmp.lt.s32.totalorder %s855_s20, %s849_s26 }
 0x219   : > { %531 = vrot.lane.b32.xlu1 %v523_v6, %s967_s25  ;;  %p858_p13 = por %p857_p2, %p856_p10 }
 0x21b   : > { %p859_p0 = pnand %p858_p13, %p852_p7 }
 0x21c   : > { %v384_v7 = vpop.permute.xlu0 %383 }
 0x21d   : > { %v386_v11 = vmul.f32 %v384_v7, %v1121_v32 }
 0x21f   : > { %v378_v8 = vpop.permute.xlu1 %377 }
 0x220   : > { %v380_v9 = vmul.f32 %v378_v8, %v1118_v28  ;;  %v394_v10 = vpop.permute.xlu0 %393 }
 0x222   : > { %v396_v12 = vadd.f32 %v394_v10, %v380_v9 }
 0x223   : > { %v404_v13 = vpop.permute.xlu1 %403 }
 0x224   : > { %407 = vst.msk [vmem:[%s204_s28] sm:$0xff] %vm229_vm0, %v396_v12  ;;  %v406_v14 = vadd.f32 %v404_v13, %v386_v11 }
 0x226   : > { %409 = vst.msk [vmem:[%s1146_s29] sm:$0xff] %vm408_vm1, %v406_v14 }
 0x27b   : > { %v442_v15 = vpop.permute.xlu0 %441 }
 0x27c   : > { %445 = vst.msk [vmem:[%s204_s28] sm:$0xff] %vm444_vm2, %v442_v15 }
 0x27f   : > { %v484_v16 = vpop.permute.xlu0 %483 }
 0x280   : > { %487 = vst.msk [vmem:[%s204_s28] sm:$0xff] %vm486_vm3, %v484_v16 }
 0x283   : > { %v448_v17 = vpop.permute.xlu1 %447 }
 0x284   : > { %451 = vst.msk [vmem:[%s1146_s29] sm:$0xff] %vm450_vm4, %v448_v17 }
 0x287   : > { %v526_v18 = vpop.permute.xlu0 %525  ;;  %v490_v19 = vpop.permute.xlu1 %489 }
 0x288   : > { %493 = vst.msk [vmem:[%s1146_s29] sm:$0xff] %vm492_vm5, %v490_v19 }
 0x289   : > { %529 = vst.msk [vmem:[%s204_s28] sm:$0xff] %vm528_vm6, %v526_v18 }
 0x28a   : > { %862 = shalt.err (!%p859_p0)
}
 0x28b   : > { %s863_s17 = scalar_lea.hbm %s1156_s9, 128  ;;  %s867_s25 = scalar_lea.hbm %s1233_s2, 256 }
 0x28c   : > { %p864_p5 = scmp.ne.s32.totalorder %s1156_s9, %s863_s17  ;;  %p868_p1 = scmp.lt.s32.totalorder %s1156_s9, %s1233_s2 }
 0x28d   : > { %p869_p4 = scmp.lt.s32.totalorder %s867_s25, %s863_s17 }
 0x28e   : > { %p865_p9 = pnand %p864_p5, %p1250_p3 }
 0x28f   : > { %p870_p6 = por %p869_p4, %p868_p1 }
 0x290   : > { %p866_p12 = pneg %p865_p9 }
 0x292   : > { %p871_p8 = pnand %p870_p6, %p866_p12 }
 0x294   : > { %874 = shalt.err (!%p871_p8)
}
 0x295   : > { %707 = dma.vmem_to_hbm [thread:$0]  (%p1250_p3), %s1158_s4, 128, %s1156_s9, %s539_s21   ;;  %vm536_vm8 = vcmask 1048064   ;;  %v532_v20 = vpop.permute.xlu1 %531 }
 0x296   : > { %s1188_s27 = scalar_lea.hbm %s1234_s3, %s697_s30  ;;  %535 = vst.msk [vmem:[%s1146_s29] sm:$0xff] %vm534_vm7, %v532_v20  ;;  %s544_s18 = scalar_lea.sflag [#allocation9], %s1097_s11 }
 0x297   : > { %537 = vst.msk [vmem:[%s1146_s29] sm:$0xff] %vm536_vm8, %v953_v0  ;;  %s875_s20 = scalar_lea.vmem %s571_s10, 128  ;;  %s969_s4 = smov [#allocation8]  }
 0x298   : > { %p876_p11 = scmp.ne.s32.totalorder %s571_s10, %s875_s20  ;;  %s879_s9 = sshll.u32 %s969_s4, 4  ;;  %s880_s9 = int_to_ptr.vmem [resolvable:$false] %s879_s9 }
 0x299   : > { %s881_s16 = scalar_lea.vmem %s880_s9, 256  ;;  %p882_p2 = scmp.lt.s32.totalorder %s571_s10, %s880_s9 }
 0x29a   : > { %p877_p7 = pnand %p876_p11, %p1250_p3  ;;  %p883_p13 = scmp.lt.s32.totalorder %s881_s16, %s875_s20 }
 0x29c   : > { %p878_p10 = pneg %p877_p7  ;;  %p884_p0 = por %p883_p13, %p882_p2 }
 0x29e   : > { %p885_p5 = pnand %p884_p0, %p878_p10 }
 0x2a0   : > { %888 = shalt.err (!%p885_p5)
}
 0x2a1   : > { %s889_s29 = scalar_lea.hbm %s1188_s27, 128  ;;  %s893_s21 = scalar_lea.hbm %s1234_s3, 256 }
 0x2a2   : > { %p890_p9 = scmp.ne.s32.totalorder %s1188_s27, %s889_s29  ;;  %p894_p4 = scmp.lt.s32.totalorder %s1188_s27, %s1234_s3 }
 0x2a3   : > { %p895_p6 = scmp.lt.s32.totalorder %s893_s21, %s889_s29 }
 0x2a4   : > { %p891_p12 = pnand %p890_p9, %p1250_p3 }
 0x2a5   : > { %p896_p8 = por %p895_p6, %p894_p4 }
 0x2a6   : > { %p892_p1 = pneg %p891_p12 }
 0x2a8   : > { %p897_p11 = pnand %p896_p8, %p892_p1 }
 0x2aa   : > { %900 = shalt.err (!%p897_p11)
}
 0x2ab   : > { %708 = dma.vmem_to_hbm [thread:$0]  (%p1250_p3), %s571_s10, 128, %s1188_s27, %s544_s18  }
 0x2ac PF: > { %s582_s23 = sand.u32 1, %s935_s12   ;;  %p1251_p7 = scmp.ne.s32.totalorder %s1240_s19, 0 }
 0x2ad   : > { %p1252_p10 = scmp.ge.s32.totalorder %s947_s15, 2  ;;  %s583_s25 = scalar_lea.sflag [#allocation4], %s582_s23 }
 0x2af   : > { %p720_p2 = pnand %p1252_p10, %p1251_p7 }
 0x2b1   : > { %p721_p13 = pneg %p720_p2 }
 0x2b3   : > { %926 = dma.done.wait (%p721_p13), %s583_s25, 128  }
 0x2b4   : > { %928 = vsyncadd (%p721_p13), %s583_s25, 4294967168  ;;  %s592_s28 = scalar_lea.sflag [#allocation9], %s582_s23 }
 0x2b5   : > { %930 = dma.done.wait (%p721_p13), %s592_s28, 128  }
 0x2b6   : > { %932 = vsyncadd (%p721_p13), %s592_s28, 4294967168  ;;  %p21_p3 = scmp.ge.s32.totalorder %s1044_s24, 4   ;;  %s1253_s12 = smov %s939_s13 }
 0x2b7   : > { %s1254_s13 = smov %s943_s14  ;;  %s1255_s14 = smov %s1061_s5 }
 0x2b8   : > { %s1256_s15 = smov %s1044_s24  ;;  %23 = sbr.rel (!%p21_p3) target bundleno = 8 (0x8), region = 94 }
 0x2bd   :  { %597 = vsyncpa [#allocation3], 1 }
 0x2be   :  { %599 = vsyncpa [#allocation3 + $0x1], 1 }
 0x2bf   :  { %600 = vsyncpa [#allocation6], 1 }
 0x2c0   :  { %601 = vsyncpa [#allocation4], 1 }
 0x2c1   :  { %603 = vsyncpa [#allocation4 + $0x1], 1 }
 0x2c2   :  { %604 = vsyncpa [#allocation9], 1 }
 0x2c3   :  { %606 = vsyncpa [#allocation9 + $0x1], 1 }

// kernel: tpu_custom_call.1
= control target key start
LH: loop header
LB: loop body
LE: loop exit
PB: predicated region body
PF: predicated region fallthrough
CT: control target
= control target key end

     0   :  { %9 = vsyncpa [#allocation3], 0  ;;  %s1231_s0 = inlined_call_operand.hbm [shape: f32[16,32], index: 0, kind: input, shape index: {}]   ;;  %s1232_s1 = inlined_call_operand.hbm [shape: f32[32,512], index: 1, kind: input, shape index: {}]   ;;  %s1233_s2 = inlined_call_operand.hbm [shape: f32[16,128], index: 2, kind: output, shape index: {0}]   ;;  %s1234_s3 = inlined_call_operand.hbm [shape: f32[16,128], index: 3, kind: output, shape index: {1}]  }
   0x1   :  { %11 = vsyncpa [#allocation3 + $0x1], 0 }
   0x2   :  { %12 = vsyncpa [#allocation6], 0 }
   0x3   :  { %13 = vsyncpa [#allocation4], 0 }
   0x4   :  { %15 = vsyncpa [#allocation4 + $0x1], 0 }
   0x5   :  { %16 = vsyncpa [#allocation9], 0 }
   0x6   :  { %18 = vsyncpa [#allocation9 + $0x1], 0  ;;  %s990_s12 = smov 0   ;;  %s992_s13 = smov 0  }
   0x7   :  { %s994_s14 = smov 0   ;;  %s996_s15 = smov 0  }
   0x8 LB: > { %s1011_s16 = sadd.s32 4294967295, %s947_s15   ;;  %s682_s17 = sadd.s32 4294967294, %s947_s15   ;;  %s947_s15 = sphi %s996_s15, %s1256_s15   ;;  %s943_s14 = sphi %s994_s14, %s1255_s14   ;;  %s939_s13 = sphi %s992_s13, %s1254_s13   ;;  %s935_s12 = sphi %s990_s12, %s1253_s12  }
   0x9   : > { %p44_p0 = scmp.ne.s32.totalorder %s939_s13, %s935_s12  ;;  %p1235_p1 = scmp.eq.s32.totalorder %s1011_s16, 0 }
   0xa   : > { %p95_p3 = scmp.eq.s32.totalorder %s682_s17, 1  ;;  %p683_p5 = scmp.ge.s32.totalorder %s947_s15, 1 }
   0xb   : > { %p1020_p4 = por %p1235_p1, %p44_p0  ;;  %p128_p7 = scmp.lt.s32.totalorder %s947_s15, 3 }
   0xc   : > { %p1025_p6 = por %p95_p3, %p44_p0  ;;  %s949_s21 = smov [#allocation5]  }
   0xd   : > { %s1239_s18 = scalar_select %p1020_p4, 1, 0 }
   0xe   : > { %s1240_s19 = scalar_select %p1025_p6, 1, 0 }
   0xf   : > { %p1030_p8 = pnand %p683_p5, %p128_p7  ;;  %s140_s22 = sshll.u32 %s949_s21, 4  ;;  %s141_s22 = int_to_ptr.vmem [resolvable:$true] %s140_s22 }
  0x10   : > { %s1044_s24 = sadd.s32 1, %s947_s15   ;;  %s31_s25 = sadd.s32 1, %s943_s14 }
  0x11   : > { %s1241_s20 = scalar_select %p1030_p8, 1, 0 }
  0x12   : > { %p711_p9 = pneg %p1030_p8  ;;  %s28_s26 = ssub.s32 %s947_s15, %s1044_s24 }
  0x13   : > { %s806_s27 = scalar_lea.vmem %s141_s22, 2048  ;;  %p814_p5 = scmp.lt.s32.totalorder %s141_s22, %s141_s22 }
  0x14   : > { %p1039_p11 = pnand %p711_p9, %p1235_p1  ;;  %p807_p13 = scmp.ne.s32.totalorder %s141_s22, %s806_s27 }
  0x15   : > { %p815_p7 = scmp.lt.s32.totalorder %s806_s27, %s806_s27 }
  0x16   : > { %p797_p12 = pneg %p1039_p11 }
  0x17   : > { %p816_p10 = por %p815_p7, %p814_p5 }
  0x18   : > { %p809_p0 = pnand %p807_p13, %p797_p12 }
  0x1a   : > { %p810_p3 = pneg %p809_p0 }
  0x1c   : > { %p817_p2 = pnand %p816_p10, %p810_p3 }
  0x1e   : > { %820 = shalt.err (!%p817_p2)
}
  0x1f   : > { %s950_s28 = smov 512   ;;  %s951_s29 = smov 32  }
  0x20   : > { %714 = dma.hbm_to_vmem [thread:$0]  (!%p1039_p11), %s1232_s1, 2048, %s141_s22, [#allocation6], %s950_s28, %s950_s28, %s951_s29  }
  0x21   : > { %p29_p9 = scmp.eq.s32.totalorder %s28_s26, 0  ;;  %p38_p12 = scmp.ne.s32.totalorder %s943_s14, %s939_s13 }
  0x22   : > { %p39_p10 = scmp.eq.s32.totalorder %s947_s15, 0  ;;  %p727_p2 = scmp.lt.s32.totalorder %s947_s15, 2 }
  0x23   : > { %s1061_s5 = scalar_select %p29_p9, %s943_s14, %s31_s25  }
  0x24   : > { %p40_p13 = por %p39_p10, %p38_p12  ;;  %p1243_p0 = scmp.eq.s32.totalorder %s1011_s16, 1 }
  0x25   : > { %s154_s7 = sand.u32 1, %s943_s14   ;;  %s687_s8 = sshll.u32 %s947_s15, 7 }
  0x26   : > { %p1065_p3 = por %p1243_p0, %p38_p12  ;;  %s686_s9 = sshll.u32 %s154_s7, 3 }
  0x27   : > { %s1074_s17 = scalar_lea.hbm %s1231_s0, %s687_s8  ;;  %s158_s21 = scalar_lea.vmem [#allocation2], %s686_s9 }
  0x28   : > { %s1244_s6 = scalar_select %p1065_p3, 1, 0 }
  0x29   : > { %s165_s22 = sshll.u32 %s158_s21, 4  ;;  %p1076_p11 = pnand %p727_p2, %p40_p13  ;;  %s166_s22 = int_to_ptr.vmem [resolvable:$true] %s165_s22 }
  0x2a   : > { %s155_s25 = scalar_lea.sflag [#allocation3], %s154_s7  ;;  %s821_s26 = scalar_lea.hbm %s1074_s17, 128 }
  0x2b   : > { %p822_p5 = scmp.ne.s32.totalorder %s1074_s17, %s821_s26  ;;  %p823_p7 = pneg %p1076_p11 }
  0x2c   : > { %s826_s29 = scalar_lea.hbm %s1231_s0, 256  ;;  %p827_p10 = scmp.lt.s32.totalorder %s1074_s17, %s1231_s0 }
  0x2d   : > { %p824_p9 = pnand %p823_p7, %p822_p5  ;;  %p828_p2 = scmp.lt.s32.totalorder %s826_s29, %s821_s26 }
  0x2f   : > { %p825_p12 = pneg %p824_p9  ;;  %p829_p13 = por %p828_p2, %p827_p10 }
  0x31   : > { %p830_p0 = pnand %p829_p13, %p825_p12 }
  0x33   : > { %833 = shalt.err (!%p830_p0)
}
  0x34   : > { %s834_s8 = scalar_lea.vmem %s166_s22, 128  ;;  %s952_s7 = smov [#allocation2]  }
  0x35   : > { %p835_p1 = scmp.ne.s32.totalorder %s166_s22, %s834_s8  ;;  %s839_s9 = sshll.u32 %s952_s7, 4  ;;  %s840_s9 = int_to_ptr.vmem [resolvable:$false] %s839_s9 }
  0x36   : > { %s841_s10 = scalar_lea.vmem %s840_s9, 256  ;;  %p842_p5 = scmp.lt.s32.totalorder %s166_s22, %s840_s9 }
  0x37   : > { %p837_p6 = pnand %p835_p1, %p823_p7  ;;  %p843_p9 = scmp.lt.s32.totalorder %s841_s10, %s834_s8 }
  0x39   : > { %p838_p3 = pneg %p837_p6  ;;  %p844_p4 = por %p843_p9, %p842_p5 }
  0x3b   : > { %p845_p8 = pnand %p844_p4, %p838_p3 }
  0x3d   : > { %848 = shalt.err (!%p845_p8)
}
  0x3e   : > { %718 = dma.hbm_to_vmem [thread:$0]  (!%p1076_p11), %s1074_s17, 128, %s166_s22, %s155_s25  }
  0x3f   : > { %p1246_p12 = scmp.ne.s32.totalorder %s1241_s20, 0 }
  0x40   : > { %s1097_s11 = sand.u32 (!%p1246_p12), 1, %s939_s13   ;;  %p1247_p1 = scmp.ne.s32.totalorder (!%p1246_p12), %s1239_s18, 0 }
  0x41   : > { %174 = sbr.rel (%p1246_p12) target bundleno = 684 (0x2ac), region = 28  ;;  %s1100_s21 = sshll.u32 (!%p1246_p12), %s1097_s11, 3 }
  0x42   : > { %s177_s26 = scalar_lea.sflag (!%p1246_p12), [#allocation3], %s1097_s11  ;;  %s180_s27 = scalar_lea.vmem (!%p1246_p12), [#allocation2], %s1100_s21 }
  0x46   : > { %918 = dma.done.wait (%p1247_p1), %s177_s26, 128  }
  0x47   : > { %920 = vsyncadd (%p1247_p1), %s177_s26, 4294967168  ;;  %p1248_p4 = scmp.eq.s32.totalorder %s1011_s16, 0 }
  0x49   : > { %922 = dma.done.wait (%p1248_p4), [#allocation6], 2048   ;;  %p1249_p6 = pmov %p1248_p4 }
  0x4a   : > { %v953_v0 = vmov 0.0   ;;  %v954_v1 = vmov 5   ;;  %v955_v2 = vmov 3   ;;  %v228_v3 = vld [vmem:[#allocation5 + $0x78] sm:$0xff]  ;;  %v227_v4 = vld [vmem:[#allocation5 + $0x70] sm:$0xff]  ;;  %v226_v9 = vld [vmem:[#allocation5 + $0x68] sm:$0xff] }
  0x4b   : > { %924 = vsyncadd (%p1249_p6), [#allocation6], 4294965248  ;;  %368 = vmatprep.mubr.f32.mxu1 %v953_v0  ;;  %297 = vmatprep.mubr.f32.mxu0 %v953_v0  ;;  %v224_v5 = vld [vmem:[#allocation5 + $0x58] sm:$0xff]  ;;  %v223_v6 = vld [vmem:[#allocation5 + $0x50] sm:$0xff]  ;;  %vm229_vm0 = vcmask 261120   ;;  %v956_v22 = vmov 7  }
  0x4c   : > { %781 = vset.pattern.permute.xlu1 %v954_v1  ;;  %780 = vset.pattern.permute.xlu0 %v955_v2  ;;  %v220_v7 = vld [vmem:[#allocation5 + $0x38] sm:$0xff]  ;;  %v219_v8 = vld [vmem:[#allocation5 + $0x30] sm:$0xff]  ;;  %v225_v10 = vld [vmem:[#allocation5 + $0x60] sm:$0xff]  ;;  %v957_v23 = vmov 2   ;;  %v958_v24 = vmov 1   ;;  %v959_v25 = vmov 4  }
  0x4d   : > { %328 = vmatprep.subr.mxu1 %v228_v3  ;;  %v222_v11 = vld [vmem:[#allocation5 + $0x48] sm:$0xff]  ;;  %v216_v12 = vld [vmem:[#allocation5 + $0x18] sm:$0xff]  ;;  %257 = vmatprep.subr.mxu0 %v226_v9  ;;  %v221_v13 = vld [vmem:[#allocation5 + $0x40] sm:$0xff]  ;;  %v960_v26 = vmov 6   ;;  %v961_v27 = vmov 0   ;;  %s962_s18 = smov 96  }
  0x4e   : > { %329 = vmatpush1.msra.mxu1 %v227_v4  ;;  %v215_v14 = vld [vmem:[#allocation5 + $0x10] sm:$0xff]  ;;  %258 = vmatpush1.msra.mxu0 %v225_v10  ;;  %v218_v15 = vld [vmem:[#allocation5 + $0x28] sm:$0xff]  ;;  %v217_v17 = vld [vmem:[#allocation5 + $0x20] sm:$0xff]  ;;  %s963_s20 = smov 112   ;;  %s964_s17 = smov 32   ;;  %vm408_vm1 = vcmask 130048  }
  0x4f   : > { %330 = vmatprep.subr.mxu1 %v224_v5  ;;  %v212_v16 = vld [vmem:[%s180_s27] sm:$0xff]  ;;  %259 = vmatprep.subr.mxu0 %v222_v11  ;;  %v214_v18 = vld [vmem:[#allocation5 + $0x8] sm:$0xff]  ;;  %v213_v19 = vld [vmem:[#allocation5] sm:$0xff]  ;;  %s965_s22 = smov 64   ;;  %s966_s23 = smov 16   ;;  %vm444_vm2 = vcmask 523520  }
  0x50   : > { %331 = vmatpush1.msra.mxu1 %v223_v6  ;;  %260 = vmatpush1.msra.mxu0 %v221_v13  ;;  %s967_s25 = smov 48   ;;  %s204_s28 = scalar_lea.vmem [#allocation7], %s1100_s21  ;;  %vm486_vm3 = vcmask 785920   ;;  %vm450_vm4 = vcmask 261248   ;;  %vm492_vm5 = vcmask 392448   ;;  %vm528_vm6 = vcmask 1048320  }
  0x51   : > { %332 = vmatprep.subr.mxu1 %v220_v7  ;;  %261 = vmatprep.subr.mxu0 %v218_v15  ;;  %s1146_s29 = scalar_lea.vmem [#allocation8], %s1100_s21  ;;  %s697_s30 = sshll.u32 %s1011_s16, 7  ;;  %vm534_vm7 = vcmask 523648  }
  0x52   : > { %333 = vmatpush1.msra.mxu1 %v219_v8  ;;  %262 = vmatpush1.msra.mxu0 %v217_v17  ;;  %s557_s4 = sshll.u32 %s204_s28, 4  ;;  %s1156_s9 = scalar_lea.hbm %s1233_s2, %s697_s30  ;;  %s1158_s4 = int_to_ptr.vmem [resolvable:$true] %s557_s4 }
  0x53   : > { %334 = vmatprep.subr.mxu1 %v216_v12  ;;  %263 = vmatprep.subr.mxu0 %v214_v18  ;;  %s570_s10 = sshll.u32 %s1146_s29, 4  ;;  %s539_s21 = scalar_lea.sflag [#allocation4], %s1097_s11  ;;  %s571_s10 = int_to_ptr.vmem [resolvable:$true] %s570_s10 }
  0x54   : > { %335 = vmatpush1.msra.mxu1 %v215_v14  ;;  %264 = vmatpush1.msra.mxu0 %v213_v19  ;;  %s849_s26 = scalar_lea.vmem %s1158_s4, 128  ;;  %p1250_p3 = scmp.ne.s32.totalorder %s1244_s6, 0 }
  0x55   : > { %694 = vmatmul.mubr.msk.f32.vlgmr.msra.gmra.mxu1 %vm229_vm0, %v212_v16  ;;  %693 = vmatmul.mubr.msk.f32.vlgmr.msra.gmra.mxu0 %vm229_vm0, %v212_v16  ;;  %p850_p8 = scmp.ne.s32.totalorder %s1158_s4, %s849_s26  ;;  %s968_s27 = smov [#allocation7]  }
  0x57   : > { %p851_p11 = pnand %p850_p8, %p1250_p3 }
  0x59   : > { %p852_p7 = pneg %p851_p11 }
 0x115   : > { %v370_v20 = vpop.f32.mrf.mxu1  ;;  %v1118_v28 = vpop.f32.mrf.mxu0 }
 0x116   : > { %463 = vperm.xlu1 %781, %v370_v20   ;;  %421 = vperm.xlu0 %780, %v370_v20  }
 0x117   : > { %v372_v21 = vpop.f32.mrf.mxu1  ;;  %v1121_v32 = vpop.f32.mrf.mxu0 }
 0x11a   : > { %473 = vperm.xlu1 %781, %v372_v21   ;;  %431 = vperm.xlu0 %780, %v372_v21  }
 0x11e   : > { %783 = vset.pattern.permute.xlu1 %v956_v22  ;;  %782 = vset.pattern.permute.xlu0 %v956_v22 }
 0x11f   : > { %505 = vperm.xlu1 %783, %v370_v20   ;;  %515 = vperm.xlu0 %782, %v372_v21  }
 0x123   : > { %785 = vset.pattern.permute.xlu1 %v957_v23  ;;  %784 = vset.pattern.permute.xlu0 %v958_v24 }
 0x124   : > { %411 = vperm.xlu1 %785, %v370_v20   ;;  %388 = vperm.xlu0 %784, %v370_v20  }
 0x128   : > { %786 = vset.pattern.permute.xlu1 %v959_v25  ;;  %787 = vset.pattern.permute.xlu0 %v960_v26 }
 0x129   : > { %453 = vperm.xlu1 %786, %v370_v20   ;;  %495 = vperm.xlu0 %787, %v370_v20  }
 0x12d   : > { %788 = vset.pattern.permute.xlu1 %v958_v24  ;;  %790 = vset.pattern.permute.xlu0 %v959_v25 }
 0x12e   : > { %398 = vperm.xlu1 %788, %v372_v21   ;;  %458 = vperm.xlu0 %790, %v372_v21  }
 0x132   : > { %789 = vset.pattern.permute.xlu1 %v957_v23  ;;  %792 = vset.pattern.permute.xlu0 %v961_v27 }
 0x133   : > { %416 = vperm.xlu1 %789, %v372_v21  }
 0x137   : > { %791 = vset.pattern.permute.xlu1 %v960_v26 }
 0x138   : > { %500 = vperm.xlu1 %791, %v372_v21  }
 0x13c   : > { %793 = vset.pattern.permute.xlu1 %v961_v27 }
 0x191   : > { %v464_v29 = vpop.permute.xlu1 %463  ;;  %v422_v30 = vpop.permute.xlu0 %421 }
 0x192   : > { %v424_v31 = vmul.f32 %v422_v30, %v1118_v28  ;;  %v466_v35 = vmul.f32 %v464_v29, %v1118_v28 }
 0x194   : > { %426 = vrot.lane.b32.xlu1 %v424_v31, %s962_s18 }
 0x195   : > { %v474_v33 = vpop.permute.xlu1 %473  ;;  %v432_v34 = vpop.permute.xlu0 %431 }
 0x196   : > { %v476_v36 = vmul.f32 %v474_v33, %v1121_v32  ;;  %v434_v37 = vmul.f32 %v432_v34, %v1121_v32 }
 0x198   : > { %468 = vrot.lane.b32.xlu1 %v466_v35, %s962_s18  ;;  %478 = vrot.lane.b32.xlu0 %v476_v36, %s963_s20 }
 0x19a   : > { %v506_v38 = vpop.permute.xlu1 %505  ;;  %v516_v39 = vpop.permute.xlu0 %515 }
 0x19b   : > { %v518_v40 = vmul.f32 %v516_v39, %v1121_v32  ;;  %v508_v41 = vmul.f32 %v506_v38, %v1118_v28 }
 0x19c   : > { %436 = vrot.lane.b32.xlu1 %v434_v37, %s963_s20 }
 0x19d   : > { %520 = vrot.lane.b32.xlu0 %v518_v40, %s963_s20 }
 0x19f   : > { %v412_v42 = vpop.permute.xlu1 %411  ;;  %v389_v43 = vpop.permute.xlu0 %388 }
 0x1a0   : > { %510 = vrot.lane.b32.xlu1 %v508_v41, %s962_s18  ;;  %v391_v44 = vmul.f32 %v389_v43, %v1118_v28  ;;  %v414_v51 = vmul.f32 %v412_v42, %v1118_v28 }
 0x1a1   : > { %383 = vperm.xlu0 %792, %v372_v21  }
 0x1a4   : > { %v454_v45 = vpop.permute.xlu1 %453  ;;  %377 = vperm.xlu1 %793, %v370_v20   ;;  %v496_v50 = vpop.permute.xlu0 %495 }
 0x1a5   : > { %393 = vrot.lane.b32.xlu0 %v391_v44, %s962_s18  ;;  %v456_v54 = vmul.f32 %v454_v45, %v1118_v28  ;;  %v498_v62 = vmul.f32 %v496_v50, %v1118_v28 }
 0x1a6   : > { %794 = vset.pattern.permute.xlu0 %v956_v22 }
 0x1a9   : > { %v399_v46 = vpop.permute.xlu1 %398  ;;  %v459_v55 = vpop.permute.xlu0 %458 }
 0x1aa   : > { %v401_v47 = vmul.f32 %v399_v46, %v1121_v32  ;;  %v461_v63 = vmul.f32 %v459_v55, %v1121_v32 }
 0x1ac   : > { %403 = vrot.lane.b32.xlu1 %v401_v47, %s963_s20 }
 0x1ae   : > { %v417_v48 = vpop.permute.xlu1 %416 }
 0x1af   : > { %v419_v58 = vmul.f32 %v417_v48, %v1121_v32 }
 0x1b3   : > { %v501_v49 = vpop.permute.xlu1 %500 }
 0x1b4   : > { %v503_v5 = vmul.f32 %v501_v49, %v1121_v32 }
 0x206   : > { %v427_v52 = vpop.permute.xlu1 %426 }
 0x207   : > { %v429_v53 = vadd.f32 %v427_v52, %v414_v51 }
 0x209   : > { %441 = vrot.lane.b32.xlu0 %v429_v53, %s964_s17 }
 0x20a   : > { %v469_v56 = vpop.permute.xlu1 %468  ;;  %v479_v59 = vpop.permute.xlu0 %478 }
 0x20b   : > { %v471_v57 = vadd.f32 %v469_v56, %v456_v54  ;;  %v481_v2 = vadd.f32 %v479_v59, %v461_v63 }
 0x20d   : > { %483 = vrot.lane.b32.xlu0 %v471_v57, %s965_s22 }
 0x20e   : > { %v437_v60 = vpop.permute.xlu1 %436 }
 0x20f   : > { %v439_v61 = vadd.f32 %v437_v60, %v419_v58  ;;  %v521_v4 = vpop.permute.xlu0 %520 }
 0x210   : > { %v523_v6 = vadd.f32 %v521_v4, %v503_v5 }
 0x211   : > { %447 = vrot.lane.b32.xlu1 %v439_v61, %s966_s23 }
 0x212   : > { %v511_v1 = vpop.permute.xlu1 %510 }
 0x213   : > { %v513_v3 = vadd.f32 %v511_v1, %v498_v62 }
 0x215   : > { %525 = vrot.lane.b32.xlu0 %v513_v3, %s962_s18  ;;  %489 = vrot.lane.b32.xlu1 %v481_v2, %s964_s17  ;;  %s853_s18 = sshll.u32 %s968_s27, 4  ;;  %s854_s18 = int_to_ptr.vmem [resolvable:$false] %s853_s18 }
 0x216   : > { %s855_s20 = scalar_lea.vmem %s854_s18, 256  ;;  %p856_p10 = scmp.lt.s32.totalorder %s1158_s4, %s854_s18 }
 0x217   : > { %p857_p2 = scmp.lt.s32.totalorder %s855_s20, %s849_s26 }
 0x219   : > { %531 = vrot.lane.b32.xlu1 %v523_v6, %s967_s25  ;;  %p858_p13 = por %p857_p2, %p856_p10 }
 0x21b   : > { %p859_p0 = pnand %p858_p13, %p852_p7 }
 0x21c   : > { %v384_v7 = vpop.permute.xlu0 %383 }
 0x21d   : > { %v386_v11 = vmul.f32 %v384_v7, %v1121_v32 }
 0x21f   : > { %v378_v8 = vpop.permute.xlu1 %377 }
 0x220   : > { %v380_v9 = vmul.f32 %v378_v8, %v1118_v28  ;;  %v394_v10 = vpop.permute.xlu0 %393 }
 0x222   : > { %v396_v12 = vadd.f32 %v394_v10, %v380_v9 }
 0x223   : > { %v404_v13 = vpop.permute.xlu1 %403 }
 0x224   : > { %407 = vst.msk [vmem:[%s204_s28] sm:$0xff] %vm229_vm0, %v396_v12  ;;  %v406_v14 = vadd.f32 %v404_v13, %v386_v11 }
 0x226   : > { %409 = vst.msk [vmem:[%s1146_s29] sm:$0xff] %vm408_vm1, %v406_v14 }
 0x27b   : > { %v442_v15 = vpop.permute.xlu0 %441 }
 0x27c   : > { %445 = vst.msk [vmem:[%s204_s28] sm:$0xff] %vm444_vm2, %v442_v15 }
 0x27f   : > { %v484_v16 = vpop.permute.xlu0 %483 }
 0x280   : > { %487 = vst.msk [vmem:[%s204_s28] sm:$0xff] %vm486_vm3, %v484_v16 }
 0x283   : > { %v448_v17 = vpop.permute.xlu1 %447 }
 0x284   : > { %451 = vst.msk [vmem:[%s1146_s29] sm:$0xff] %vm450_vm4, %v448_v17 }
 0x287   : > { %v526_v18 = vpop.permute.xlu0 %525  ;;  %v490_v19 = vpop.permute.xlu1 %489 }
 0x288   : > { %493 = vst.msk [vmem:[%s1146_s29] sm:$0xff] %vm492_vm5, %v490_v19 }
 0x289   : > { %529 = vst.msk [vmem:[%s204_s28] sm:$0xff] %vm528_vm6, %v526_v18 }
 0x28a   : > { %862 = shalt.err (!%p859_p0)
}
 0x28b   : > { %s863_s17 = scalar_lea.hbm %s1156_s9, 128  ;;  %s867_s25 = scalar_lea.hbm %s1233_s2, 256 }
 0x28c   : > { %p864_p5 = scmp.ne.s32.totalorder %s1156_s9, %s863_s17  ;;  %p868_p1 = scmp.lt.s32.totalorder %s1156_s9, %s1233_s2 }
 0x28d   : > { %p869_p4 = scmp.lt.s32.totalorder %s867_s25, %s863_s17 }
 0x28e   : > { %p865_p9 = pnand %p864_p5, %p1250_p3 }
 0x28f   : > { %p870_p6 = por %p869_p4, %p868_p1 }
 0x290   : > { %p866_p12 = pneg %p865_p9 }
 0x292   : > { %p871_p8 = pnand %p870_p6, %p866_p12 }
 0x294   : > { %874 = shalt.err (!%p871_p8)
}
 0x295   : > { %707 = dma.vmem_to_hbm [thread:$0]  (%p1250_p3), %s1158_s4, 128, %s1156_s9, %s539_s21   ;;  %vm536_vm8 = vcmask 1048064   ;;  %v532_v20 = vpop.permute.xlu1 %531 }
 0x296   : > { %s1188_s27 = scalar_lea.hbm %s1234_s3, %s697_s30  ;;  %535 = vst.msk [vmem:[%s1146_s29] sm:$0xff] %vm534_vm7, %v532_v20  ;;  %s544_s18 = scalar_lea.sflag [#allocation9], %s1097_s11 }
 0x297   : > { %537 = vst.msk [vmem:[%s1146_s29] sm:$0xff] %vm536_vm8, %v953_v0  ;;  %s875_s20 = scalar_lea.vmem %s571_s10, 128  ;;  %s969_s4 = smov [#allocation8]  }
 0x298   : > { %p876_p11 = scmp.ne.s32.totalorder %s571_s10, %s875_s20  ;;  %s879_s9 = sshll.u32 %s969_s4, 4  ;;  %s880_s9 = int_to_ptr.vmem [resolvable:$false] %s879_s9 }
 0x299   : > { %s881_s16 = scalar_lea.vmem %s880_s9, 256  ;;  %p882_p2 = scmp.lt.s32.totalorder %s571_s10, %s880_s9 }
 0x29a   : > { %p877_p7 = pnand %p876_p11, %p1250_p3  ;;  %p883_p13 = scmp.lt.s32.totalorder %s881_s16, %s875_s20 }
 0x29c   : > { %p878_p10 = pneg %p877_p7  ;;  %p884_p0 = por %p883_p13, %p882_p2 }
 0x29e   : > { %p885_p5 = pnand %p884_p0, %p878_p10 }
 0x2a0   : > { %888 = shalt.err (!%p885_p5)
}
 0x2a1   : > { %s889_s29 = scalar_lea.hbm %s1188_s27, 128  ;;  %s893_s21 = scalar_lea.hbm %s1234_s3, 256 }
 0x2a2   : > { %p890_p9 = scmp.ne.s32.totalorder %s1188_s27, %s889_s29  ;;  %p894_p4 = scmp.lt.s32.totalorder %s1188_s27, %s1234_s3 }
 0x2a3   : > { %p895_p6 = scmp.lt.s32.totalorder %s893_s21, %s889_s29 }
 0x2a4   : > { %p891_p12 = pnand %p890_p9, %p1250_p3 }
 0x2a5   : > { %p896_p8 = por %p895_p6, %p894_p4 }
 0x2a6   : > { %p892_p1 = pneg %p891_p12 }
 0x2a8   : > { %p897_p11 = pnand %p896_p8, %p892_p1 }
 0x2aa   : > { %900 = shalt.err (!%p897_p11)
}
 0x2ab   : > { %708 = dma.vmem_to_hbm [thread:$0]  (%p1250_p3), %s571_s10, 128, %s1188_s27, %s544_s18  }
 0x2ac PF: > { %s582_s23 = sand.u32 1, %s935_s12   ;;  %p1251_p7 = scmp.ne.s32.totalorder %s1240_s19, 0 }
 0x2ad   : > { %p1252_p10 = scmp.ge.s32.totalorder %s947_s15, 2  ;;  %s583_s25 = scalar_lea.sflag [#allocation4], %s582_s23 }
 0x2af   : > { %p720_p2 = pnand %p1252_p10, %p1251_p7 }
 0x2b1   : > { %p721_p13 = pneg %p720_p2 }
 0x2b3   : > { %926 = dma.done.wait (%p721_p13), %s583_s25, 128  }
 0x2b4   : > { %928 = vsyncadd (%p721_p13), %s583_s25, 4294967168  ;;  %s592_s28 = scalar_lea.sflag [#allocation9], %s582_s23 }
 0x2b5   : > { %930 = dma.done.wait (%p721_p13), %s592_s28, 128  }
 0x2b6   : > { %932 = vsyncadd (%p721_p13), %s592_s28, 4294967168  ;;  %p21_p3 = scmp.ge.s32.totalorder %s1044_s24, 4   ;;  %s1253_s12 = smov %s939_s13 }
 0x2b7   : > { %s1254_s13 = smov %s943_s14  ;;  %s1255_s14 = smov %s1061_s5 }
 0x2b8   : > { %s1256_s15 = smov %s1044_s24  ;;  %23 = sbr.rel (!%p21_p3) target bundleno = 8 (0x8), region = 94 }
 0x2bd   :  { %597 = vsyncpa [#allocation3], 1 }
 0x2be   :  { %599 = vsyncpa [#allocation3 + $0x1], 1 }
 0x2bf   :  { %600 = vsyncpa [#allocation6], 1 }
 0x2c0   :  { %601 = vsyncpa [#allocation4], 1 }
 0x2c1   :  { %603 = vsyncpa [#allocation4 + $0x1], 1 }
 0x2c2   :  { %604 = vsyncpa [#allocation9], 1 }
 0x2c3   :  { %606 = vsyncpa [#allocation9 + $0x1], 1 }

</bundles_post_ra>
